<compile_context>
chip_gen: v7x
topology: tpu7x:2x2x1
jax: 0.10.0
libtpu: 0.0.40
codegen_flags: <defaults>
</compile_context>

<pallas_src>
import functools

import jax
import jax.numpy as jnp
from jax import lax
from jax.experimental import pallas as pl
from jax.experimental.pallas import tpu as pltpu


def basic_policy_rollout_kernel(
    # inputs (whole arrays, resident in VMEM for the full rollout)
    obs_ref, act_ref, mask_ref, h0_ref, c0_ref,
    w1_ref, w2_ref, wia_ref, wif_ref, whh_ref,
    b1_ref, b2_ref, bg_ref, wout_ref, bout_ref,
    # outputs
    val_ref, hT_ref, cT_ref,
    # VMEM scratch
    pg_ref, hs_ref,
    *, T, B, H,
):
    # ---------------- phase 1: batched, non-recurrent compute over all T*B rows ----------
    obs = obs_ref[...]                                   # [T*B, OBS]
    act = act_ref[...]                                   # [T*B, ACT]

    f1 = jnp.maximum(
        jnp.dot(obs, w1_ref[...], preferred_element_type=jnp.float32) + b1_ref[...], 0.0)
    feat = jnp.dot(f1, w2_ref[...], preferred_element_type=jnp.float32) + b2_ref[...]

    # pre_gates = [act | feat] @ [W_ia; W_if] + (b_ih + b_hh), computed as two dots to avoid
    # a non-lane-aligned concat.  Stored to VMEM scratch, read B rows per recurrent step.
    pg_ref[...] = (
        jnp.dot(act, wia_ref[...], preferred_element_type=jnp.float32)
        + jnp.dot(feat, wif_ref[...], preferred_element_type=jnp.float32)
        + bg_ref[...])

    # ---------------- phase 2: serial masked-LSTM recurrence (dependence-bound) ----------
    whh = whh_ref[...]                                   # hoisted: loaded once

    def step(t, carry):
        h, c = carry
        row = pl.multiple_of(t * B, B)                   # sublane-aligned (B == 8 here)
        m = mask_ref[pl.ds(row, B), :]                   # [B, 1] episode-reset mask
        hm = h * m
        cm = c * m
        gates = pg_ref[pl.ds(row, B), :] + jnp.dot(
            hm, whh, preferred_element_type=jnp.float32)          # [B, 4H]
        # One sigmoid + one tanh EUP pass over the full gates vreg, then slice (i, f, g, o).
        sig = jax.nn.sigmoid(gates)
        th = jnp.tanh(gates)
        i_g = sig[:, 0 * H:1 * H]
        f_g = sig[:, 1 * H:2 * H]
        g_g = th[:, 2 * H:3 * H]
        o_g = sig[:, 3 * H:4 * H]
        c_new = f_g * cm + i_g * g_g
        h_new = o_g * jnp.tanh(c_new)
        hs_ref[pl.ds(row, B), :] = h_new                 # stash h_t for the batched value head
        return h_new, c_new

    h_fin, c_fin = lax.fori_loop(0, T, step, (h0_ref[...], c0_ref[...]), unroll=True)
    hT_ref[...] = h_fin
    cT_ref[...] = c_fin

    # ---------------- phase 3: batched value head, single output write -------------------
    # Linear(H, 1) as VPU multiply + lane reduce over all T*B rows at once.
    val_ref[...] = (
        jnp.sum(hs_ref[...] * wout_ref[...], axis=-1, keepdims=True) + bout_ref[...])


def basic_policy_rollout(obs_seq, act_seq, mask_seq, h0, c0, params):
    """Runs T steps of BasicPolicy (critic branch) in a single Pallas kernel invocation.

    obs_seq:  [T, B, OBS]   act_seq: [T, B, ACT]   mask_seq: [T, B, 1]
    h0, c0:   [B, H]
    Returns: values [T, B, 1], h_T [B, H], c_T [B, H].
    """
    T, B, OBS = obs_seq.shape
    ACT = act_seq.shape[-1]
    F = params["w1"].shape[-1]
    H = h0.shape[-1]
    O = params["w_out"].shape[-1]
    assert O == 1, "critic head (Linear(hidden, 1)); an actor logits head would use an MXU dot"

    # ---- host-side constant folding / flattening ----
    obs2d = obs_seq.reshape(T * B, OBS)
    act2d = act_seq.reshape(T * B, ACT)
    mask2d = mask_seq.reshape(T * B, 1)
    bg = params["b_ih"] + params["b_hh"]                 # [1, 4H]  fold the two LSTM biases
    w_out_row = params["w_out"].T.reshape(1, H)          # [1, H]   Linear(H, 1) weight row

    kernel = functools.partial(basic_policy_rollout_kernel, T=T, B=B, H=H)

    out_shapes = (
        jax.ShapeDtypeStruct((T * B, O), jnp.float32),   # per-step values (flattened)
        jax.ShapeDtypeStruct((B, H), jnp.float32),       # final h
        jax.ShapeDtypeStruct((B, H), jnp.float32),       # final c
    )

    vals, h_T, c_T = pl.pallas_call(
        kernel,
        out_shape=out_shapes,
        scratch_shapes=[
            pltpu.VMEM((T * B, 4 * H), jnp.float32),     # pre_gates
            pltpu.VMEM((T * B, H), jnp.float32),         # stacked h_t for the value head
        ],
    )(obs2d, act2d, mask2d, h0, c0,
      params["w1"], params["w2"], params["w_ia"], params["w_if"], params["w_hh"],
      params["b1"], params["b2"], bg, w_out_row, params["b_out"])

    return vals.reshape(T, B, O), h_T, c_T


def reference_rollout(obs_seq, act_seq, mask_seq, h, c, p):
    """Pure-JAX reference using the original (unpacked) parameters."""
    H = h.shape[-1]
    outs = []
    for t in range(obs_seq.shape[0]):
        obs, act, m = obs_seq[t], act_seq[t], mask_seq[t]
        f1 = jnp.maximum(obs @ p["w1"] + p["b1"], 0.0)
        feat = f1 @ p["w2"] + p["b2"]
        hm = h * m
        cm = c * m
        gates = act @ p["w_ia"] + feat @ p["w_if"] + p["b_ih"] + hm @ p["w_hh"] + p["b_hh"]
        i_g = jax.nn.sigmoid(gates[:, 0 * H:1 * H])
        f_g = jax.nn.sigmoid(gates[:, 1 * H:2 * H])
        g_g = jnp.tanh(gates[:, 2 * H:3 * H])
        o_g = jax.nn.sigmoid(gates[:, 3 * H:4 * H])
        c = f_g * cm + i_g * g_g
        h = o_g * jnp.tanh(c)
        outs.append(h @ p["w_out"] + p["b_out"])
    return jnp.stack(outs, 0), h, c


def make_params(key, obs_dim, act_dim, flatten_out, hidden, out_dim):
    ks = jax.random.split(key, 8)
    s = 0.1
    f32 = jnp.float32
    return {
        # feature extractor: Linear(obs_dim, F) -> ReLU -> Linear(F, F)
        "w1": s * jax.random.normal(ks[0], (obs_dim, flatten_out), f32),
        "b1": jnp.zeros((1, flatten_out), f32),
        "w2": s * jax.random.normal(ks[1], (flatten_out, flatten_out), f32),
        "b2": jnp.zeros((1, flatten_out), f32),
        # LSTM cell: input = [action, features]  (W_ih split into action / feature parts)
        "w_ia": s * jax.random.normal(ks[2], (act_dim, 4 * hidden), f32),
        "w_if": s * jax.random.normal(ks[3], (flatten_out, 4 * hidden), f32),
        "b_ih": jnp.zeros((1, 4 * hidden), f32),
        "w_hh": s * jax.random.normal(ks[4], (hidden, 4 * hidden), f32),
        "b_hh": jnp.zeros((1, 4 * hidden), f32),
        # output layer (critic head: Linear(hidden, 1))
        "w_out": s * jax.random.normal(ks[5], (hidden, out_dim), f32),
        "b_out": jnp.zeros((1, out_dim), f32),
    }


if __name__ == "__main__":
    T, B, OBS, ACT, F, H, OUT = 8, 8, 24, 4, 32, 32, 1

    key = jax.random.PRNGKey(0)
    kp, ko, ka, kh, kc, km = jax.random.split(key, 6)

    params = make_params(kp, OBS, ACT, F, H, OUT)
    obs_seq = jax.random.normal(ko, (T, B, OBS), jnp.float32)     # inputs[model_type] over T steps
    act_seq = jax.random.normal(ka, (T, B, ACT), jnp.float32)     # inputs['past_action'] over T steps
    h0 = jax.random.normal(kh, (B, H), jnp.float32)               # rnn_hxs[0]
    c0 = jax.random.normal(kc, (B, H), jnp.float32)               # rnn_hxs[1]
    # Episode-reset masks: mostly 1.0, a few 0.0 resets scattered through the rollout.
    mask_seq = (jax.random.uniform(km, (T, B, 1)) > 0.15).astype(jnp.float32)

    vals, h_T, c_T = basic_policy_rollout(obs_seq, act_seq, mask_seq, h0, c0, params)
    jax.block_until_ready((vals, h_T, c_T))

    ref_vals, ref_h, ref_c = reference_rollout(obs_seq, act_seq, mask_seq, h0, c0, params)
    assert jnp.allclose(vals, ref_vals, atol=1e-4), "per-step values mismatch"
    assert jnp.allclose(h_T, ref_h, atol=1e-4), "final h mismatch"
    assert jnp.allclose(c_T, ref_c, atol=1e-4), "final c mismatch"

    print("KERNEL_OK")
</pallas_src>

<mosaic_0001>
module attributes {stable_mosaic.version = 11 : i64} {
  func.func @basic_policy_rollout_kernel(%arg0: memref<64x24xf32, #tpu.memory_space<vmem>>, %arg1: memref<64x4xf32, #tpu.memory_space<vmem>>, %arg2: memref<64x1xf32, #tpu.memory_space<vmem>>, %arg3: memref<8x32xf32, #tpu.memory_space<vmem>>, %arg4: memref<8x32xf32, #tpu.memory_space<vmem>>, %arg5: memref<24x32xf32, #tpu.memory_space<vmem>>, %arg6: memref<32x32xf32, #tpu.memory_space<vmem>>, %arg7: memref<4x128xf32, #tpu.memory_space<vmem>>, %arg8: memref<32x128xf32, #tpu.memory_space<vmem>>, %arg9: memref<32x128xf32, #tpu.memory_space<vmem>>, %arg10: memref<1x32xf32, #tpu.memory_space<vmem>>, %arg11: memref<1x32xf32, #tpu.memory_space<vmem>>, %arg12: memref<1x128xf32, #tpu.memory_space<vmem>>, %arg13: memref<1x32xf32, #tpu.memory_space<vmem>>, %arg14: memref<1x1xf32, #tpu.memory_space<vmem>>, %arg15: memref<64x1xf32, #tpu.memory_space<vmem>>, %arg16: memref<8x32xf32, #tpu.memory_space<vmem>>, %arg17: memref<8x32xf32, #tpu.memory_space<vmem>>, %arg18: memref<64x128xf32, #tpu.memory_space<vmem>>, %arg19: memref<64x32xf32, #tpu.memory_space<vmem>>) attributes {dimension_semantics = [], scalar_prefetch = 0 : i64, scratch_operands = 2 : i64, tpu.core_type = #tpu.core_type<tc>} {
    %c0 = arith.constant 0 : index
    %c0_0 = arith.constant 0 : index
    %0 = vector.load %arg0[%c0, %c0_0] : memref<64x24xf32, #tpu.memory_space<vmem>>, vector<64x24xf32>
    %c0_1 = arith.constant 0 : index
    %c0_2 = arith.constant 0 : index
    %1 = vector.load %arg1[%c0_1, %c0_2] : memref<64x4xf32, #tpu.memory_space<vmem>>, vector<64x4xf32>
    %c0_3 = arith.constant 0 : index
    %c0_4 = arith.constant 0 : index
    %2 = vector.load %arg5[%c0_3, %c0_4] : memref<24x32xf32, #tpu.memory_space<vmem>>, vector<24x32xf32>
    %cst = arith.constant dense<0.000000e+00> : vector<64x32xf32>
    %3 = tpu.matmul %0, %2, %cst {dimension_numbers = #tpu.dot_dimension_numbers<[1], [0], [0], [1], [0, 0, 1, 1], [], []>} : vector<64x24xf32>, vector<24x32xf32>, vector<64x32xf32> -> vector<64x32xf32>
    %c0_5 = arith.constant 0 : index
    %c0_6 = arith.constant 0 : index
    %4 = vector.load %arg10[%c0_5, %c0_6] : memref<1x32xf32, #tpu.memory_space<vmem>>, vector<1x32xf32>
    %5 = vector.broadcast %4 : vector<1x32xf32> to vector<64x32xf32>
    %6 = arith.addf %3, %5 : vector<64x32xf32>
    %cst_7 = arith.constant 0.000000e+00 : f32
    %7 = vector.broadcast %cst_7 : f32 to vector<64x32xf32>
    %8 = arith.maximumf %6, %7 : vector<64x32xf32>
    %c0_8 = arith.constant 0 : index
    %c0_9 = arith.constant 0 : index
    %9 = vector.load %arg6[%c0_8, %c0_9] : memref<32x32xf32, #tpu.memory_space<vmem>>, vector<32x32xf32>
    %cst_10 = arith.constant dense<0.000000e+00> : vector<64x32xf32>
    %10 = tpu.matmul %8, %9, %cst_10 {dimension_numbers = #tpu.dot_dimension_numbers<[1], [0], [0], [1], [0, 0, 1, 1], [], []>} : vector<64x32xf32>, vector<32x32xf32>, vector<64x32xf32> -> vector<64x32xf32>
    %c0_11 = arith.constant 0 : index
    %c0_12 = arith.constant 0 : index
    %11 = vector.load %arg11[%c0_11, %c0_12] : memref<1x32xf32, #tpu.memory_space<vmem>>, vector<1x32xf32>
    %12 = vector.broadcast %11 : vector<1x32xf32> to vector<64x32xf32>
    %13 = arith.addf %10, %12 : vector<64x32xf32>
    %c0_13 = arith.constant 0 : index
    %c0_14 = arith.constant 0 : index
    %14 = vector.load %arg7[%c0_13, %c0_14] : memref<4x128xf32, #tpu.memory_space<vmem>>, vector<4x128xf32>
    %cst_15 = arith.constant dense<0.000000e+00> : vector<64x128xf32>
    %15 = tpu.matmul %1, %14, %cst_15 {dimension_numbers = #tpu.dot_dimension_numbers<[1], [0], [0], [1], [0, 0, 1, 1], [], []>} : vector<64x4xf32>, vector<4x128xf32>, vector<64x128xf32> -> vector<64x128xf32>
    %c0_16 = arith.constant 0 : index
    %c0_17 = arith.constant 0 : index
    %16 = vector.load %arg8[%c0_16, %c0_17] : memref<32x128xf32, #tpu.memory_space<vmem>>, vector<32x128xf32>
    %cst_18 = arith.constant dense<0.000000e+00> : vector<64x128xf32>
    %17 = tpu.matmul %13, %16, %cst_18 {dimension_numbers = #tpu.dot_dimension_numbers<[1], [0], [0], [1], [0, 0, 1, 1], [], []>} : vector<64x32xf32>, vector<32x128xf32>, vector<64x128xf32> -> vector<64x128xf32>
    %18 = arith.addf %15, %17 : vector<64x128xf32>
    %c0_19 = arith.constant 0 : index
    %c0_20 = arith.constant 0 : index
    %19 = vector.load %arg12[%c0_19, %c0_20] : memref<1x128xf32, #tpu.memory_space<vmem>>, vector<1x128xf32>
    %20 = vector.broadcast %19 : vector<1x128xf32> to vector<64x128xf32>
    %21 = arith.addf %18, %20 : vector<64x128xf32>
    %c0_21 = arith.constant 0 : index
    %c0_22 = arith.constant 0 : index
    %22 = vector.load %arg18[%c0_21, %c0_22] : memref<64x128xf32, #tpu.memory_space<vmem>>, vector<64x128xf32>
    tpu.vector_store %arg18[%c0_21, %c0_22], %21 {strides = array<i32>} : memref<64x128xf32, #tpu.memory_space<vmem>>, vector<64x128xf32>,
    %c0_23 = arith.constant 0 : index
    %c0_24 = arith.constant 0 : index
    %23 = vector.load %arg9[%c0_23, %c0_24] : memref<32x128xf32, #tpu.memory_space<vmem>>, vector<32x128xf32>
    %c0_25 = arith.constant 0 : index
    %c0_26 = arith.constant 0 : index
    %24 = vector.load %arg3[%c0_25, %c0_26] : memref<8x32xf32, #tpu.memory_space<vmem>>, vector<8x32xf32>
    %c0_27 = arith.constant 0 : index
    %c0_28 = arith.constant 0 : index
    %25 = vector.load %arg4[%c0_27, %c0_28] : memref<8x32xf32, #tpu.memory_space<vmem>>, vector<8x32xf32>
    %c0_i32 = arith.constant 0 : i32
    %c8_i32 = arith.constant 8 : i32
    %26 = arith.muli %c0_i32, %c8_i32 : i32
    %27 = tpu.assume_multiple %26, 8 : i32
    %28 = arith.index_cast %27 : i32 to index
    %c0_29 = arith.constant 0 : index
    %29 = vector.load %arg2[%28, %c0_29] : memref<64x1xf32, #tpu.memory_space<vmem>>, vector<8x1xf32>
    %30 = vector.broadcast %29 : vector<8x1xf32> to vector<8x32xf32>
    %31 = arith.mulf %24, %30 : vector<8x32xf32>
    %32 = vector.broadcast %29 : vector<8x1xf32> to vector<8x32xf32>
    %33 = arith.mulf %25, %32 : vector<8x32xf32>
    %34 = arith.index_cast %27 : i32 to index
    %c0_30 = arith.constant 0 : index
    %35 = vector.load %arg18[%34, %c0_30] : memref<64x128xf32, #tpu.memory_space<vmem>>, vector<8x128xf32>
    %cst_31 = arith.constant dense<0.000000e+00> : vector<8x128xf32>
    %36 = tpu.matmul %31, %23, %cst_31 {dimension_numbers = #tpu.dot_dimension_numbers<[1], [0], [0], [1], [0, 0, 1, 1], [], []>} : vector<8x32xf32>, vector<32x128xf32>, vector<8x128xf32> -> vector<8x128xf32>
    %37 = arith.addf %35, %36 : vector<8x128xf32>
    %38 = arith.negf %37 : vector<8x128xf32>
    %39 = math.exp %38 : vector<8x128xf32>
    %cst_32 = arith.constant 1.000000e+00 : f32
    %40 = vector.broadcast %cst_32 : f32 to vector<8x128xf32>
    %41 = arith.addf %40, %39 : vector<8x128xf32>
    %42 = arith.divf %40, %41 : vector<8x128xf32>
    %43 = math.tanh %37 : vector<8x128xf32>
    %44 = vector.extract_strided_slice %42 {offsets = [0, 0], sizes = [8, 32], strides = [1, 1]} : vector<8x128xf32> to vector<8x32xf32>
    %45 = vector.extract_strided_slice %42 {offsets = [0, 32], sizes = [8, 32], strides = [1, 1]} : vector<8x128xf32> to vector<8x32xf32>
    %46 = vector.extract_strided_slice %43 {offsets = [0, 64], sizes = [8, 32], strides = [1, 1]} : vector<8x128xf32> to vector<8x32xf32>
    %47 = vector.extract_strided_slice %42 {offsets = [0, 96], sizes = [8, 32], strides = [1, 1]} : vector<8x128xf32> to vector<8x32xf32>
    %48 = arith.mulf %45, %33 : vector<8x32xf32>
    %49 = arith.mulf %44, %46 : vector<8x32xf32>
    %50 = arith.addf %48, %49 : vector<8x32xf32>
    %51 = math.tanh %50 : vector<8x32xf32>
    %52 = arith.mulf %47, %51 : vector<8x32xf32>
    %53 = arith.index_cast %27 : i32 to index
    %c0_33 = arith.constant 0 : index
    %54 = vector.load %arg19[%53, %c0_33] : memref<64x32xf32, #tpu.memory_space<vmem>>, vector<8x32xf32>
    tpu.vector_store %arg19[%53, %c0_33], %52 {strides = array<i32>} : memref<64x32xf32, #tpu.memory_space<vmem>>, vector<8x32xf32>,
    %c1_i32 = arith.constant 1 : i32
    %c8_i32_34 = arith.constant 8 : i32
    %55 = arith.muli %c1_i32, %c8_i32_34 : i32
    %56 = tpu.assume_multiple %55, 8 : i32
    %57 = arith.index_cast %56 : i32 to index
    %c0_35 = arith.constant 0 : index
    %58 = vector.load %arg2[%57, %c0_35] : memref<64x1xf32, #tpu.memory_space<vmem>>, vector<8x1xf32>
    %59 = vector.broadcast %58 : vector<8x1xf32> to vector<8x32xf32>
    %60 = arith.mulf %52, %59 : vector<8x32xf32>
    %61 = vector.broadcast %58 : vector<8x1xf32> to vector<8x32xf32>
    %62 = arith.mulf %50, %61 : vector<8x32xf32>
    %63 = arith.index_cast %56 : i32 to index
    %c0_36 = arith.constant 0 : index
    %64 = vector.load %arg18[%63, %c0_36] : memref<64x128xf32, #tpu.memory_space<vmem>>, vector<8x128xf32>
    %cst_37 = arith.constant dense<0.000000e+00> : vector<8x128xf32>
    %65 = tpu.matmul %60, %23, %cst_37 {dimension_numbers = #tpu.dot_dimension_numbers<[1], [0], [0], [1], [0, 0, 1, 1], [], []>} : vector<8x32xf32>, vector<32x128xf32>, vector<8x128xf32> -> vector<8x128xf32>
    %66 = arith.addf %64, %65 : vector<8x128xf32>
    %67 = arith.negf %66 : vector<8x128xf32>
    %68 = math.exp %67 : vector<8x128xf32>
    %cst_38 = arith.constant 1.000000e+00 : f32
    %69 = vector.broadcast %cst_38 : f32 to vector<8x128xf32>
    %70 = arith.addf %69, %68 : vector<8x128xf32>
    %71 = arith.divf %69, %70 : vector<8x128xf32>
    %72 = math.tanh %66 : vector<8x128xf32>
    %73 = vector.extract_strided_slice %71 {offsets = [0, 0], sizes = [8, 32], strides = [1, 1]} : vector<8x128xf32> to vector<8x32xf32>
    %74 = vector.extract_strided_slice %71 {offsets = [0, 32], sizes = [8, 32], strides = [1, 1]} : vector<8x128xf32> to vector<8x32xf32>
    %75 = vector.extract_strided_slice %72 {offsets = [0, 64], sizes = [8, 32], strides = [1, 1]} : vector<8x128xf32> to vector<8x32xf32>
    %76 = vector.extract_strided_slice %71 {offsets = [0, 96], sizes = [8, 32], strides = [1, 1]} : vector<8x128xf32> to vector<8x32xf32>
    %77 = arith.mulf %74, %62 : vector<8x32xf32>
    %78 = arith.mulf %73, %75 : vector<8x32xf32>
    %79 = arith.addf %77, %78 : vector<8x32xf32>
    %80 = math.tanh %79 : vector<8x32xf32>
    %81 = arith.mulf %76, %80 : vector<8x32xf32>
    %82 = arith.index_cast %56 : i32 to index
    %c0_39 = arith.constant 0 : index
    %83 = vector.load %arg19[%82, %c0_39] : memref<64x32xf32, #tpu.memory_space<vmem>>, vector<8x32xf32>
    tpu.vector_store %arg19[%82, %c0_39], %81 {strides = array<i32>} : memref<64x32xf32, #tpu.memory_space<vmem>>, vector<8x32xf32>,
    %c2_i32 = arith.constant 2 : i32
    %c8_i32_40 = arith.constant 8 : i32
    %84 = arith.muli %c2_i32, %c8_i32_40 : i32
    %85 = tpu.assume_multiple %84, 8 : i32
    %86 = arith.index_cast %85 : i32 to index
    %c0_41 = arith.constant 0 : index
    %87 = vector.load %arg2[%86, %c0_41] : memref<64x1xf32, #tpu.memory_space<vmem>>, vector<8x1xf32>
    %88 = vector.broadcast %87 : vector<8x1xf32> to vector<8x32xf32>
    %89 = arith.mulf %81, %88 : vector<8x32xf32>
    %90 = vector.broadcast %87 : vector<8x1xf32> to vector<8x32xf32>
    %91 = arith.mulf %79, %90 : vector<8x32xf32>
    %92 = arith.index_cast %85 : i32 to index
    %c0_42 = arith.constant 0 : index
    %93 = vector.load %arg18[%92, %c0_42] : memref<64x128xf32, #tpu.memory_space<vmem>>, vector<8x128xf32>
    %cst_43 = arith.constant dense<0.000000e+00> : vector<8x128xf32>
    %94 = tpu.matmul %89, %23, %cst_43 {dimension_numbers = #tpu.dot_dimension_numbers<[1], [0], [0], [1], [0, 0, 1, 1], [], []>} : vector<8x32xf32>, vector<32x128xf32>, vector<8x128xf32> -> vector<8x128xf32>
    %95 = arith.addf %93, %94 : vector<8x128xf32>
    %96 = arith.negf %95 : vector<8x128xf32>
    %97 = math.exp %96 : vector<8x128xf32>
    %cst_44 = arith.constant 1.000000e+00 : f32
    %98 = vector.broadcast %cst_44 : f32 to vector<8x128xf32>
    %99 = arith.addf %98, %97 : vector<8x128xf32>
    %100 = arith.divf %98, %99 : vector<8x128xf32>
    %101 = math.tanh %95 : vector<8x128xf32>
    %102 = vector.extract_strided_slice %100 {offsets = [0, 0], sizes = [8, 32], strides = [1, 1]} : vector<8x128xf32> to vector<8x32xf32>
    %103 = vector.extract_strided_slice %100 {offsets = [0, 32], sizes = [8, 32], strides = [1, 1]} : vector<8x128xf32> to vector<8x32xf32>
    %104 = vector.extract_strided_slice %101 {offsets = [0, 64], sizes = [8, 32], strides = [1, 1]} : vector<8x128xf32> to vector<8x32xf32>
    %105 = vector.extract_strided_slice %100 {offsets = [0, 96], sizes = [8, 32], strides = [1, 1]} : vector<8x128xf32> to vector<8x32xf32>
    %106 = arith.mulf %103, %91 : vector<8x32xf32>
    %107 = arith.mulf %102, %104 : vector<8x32xf32>
    %108 = arith.addf %106, %107 : vector<8x32xf32>
    %109 = math.tanh %108 : vector<8x32xf32>
    %110 = arith.mulf %105, %109 : vector<8x32xf32>
    %111 = arith.index_cast %85 : i32 to index
    %c0_45 = arith.constant 0 : index
    %112 = vector.load %arg19[%111, %c0_45] : memref<64x32xf32, #tpu.memory_space<vmem>>, vector<8x32xf32>
    tpu.vector_store %arg19[%111, %c0_45], %110 {strides = array<i32>} : memref<64x32xf32, #tpu.memory_space<vmem>>, vector<8x32xf32>,
    %c3_i32 = arith.constant 3 : i32
    %c8_i32_46 = arith.constant 8 : i32
    %113 = arith.muli %c3_i32, %c8_i32_46 : i32
    %114 = tpu.assume_multiple %113, 8 : i32
    %115 = arith.index_cast %114 : i32 to index
    %c0_47 = arith.constant 0 : index
    %116 = vector.load %arg2[%115, %c0_47] : memref<64x1xf32, #tpu.memory_space<vmem>>, vector<8x1xf32>
    %117 = vector.broadcast %116 : vector<8x1xf32> to vector<8x32xf32>
    %118 = arith.mulf %110, %117 : vector<8x32xf32>
    %119 = vector.broadcast %116 : vector<8x1xf32> to vector<8x32xf32>
    %120 = arith.mulf %108, %119 : vector<8x32xf32>
    %121 = arith.index_cast %114 : i32 to index
    %c0_48 = arith.constant 0 : index
    %122 = vector.load %arg18[%121, %c0_48] : memref<64x128xf32, #tpu.memory_space<vmem>>, vector<8x128xf32>
    %cst_49 = arith.constant dense<0.000000e+00> : vector<8x128xf32>
    %123 = tpu.matmul %118, %23, %cst_49 {dimension_numbers = #tpu.dot_dimension_numbers<[1], [0], [0], [1], [0, 0, 1, 1], [], []>} : vector<8x32xf32>, vector<32x128xf32>, vector<8x128xf32> -> vector<8x128xf32>
    %124 = arith.addf %122, %123 : vector<8x128xf32>
    %125 = arith.negf %124 : vector<8x128xf32>
    %126 = math.exp %125 : vector<8x128xf32>
    %cst_50 = arith.constant 1.000000e+00 : f32
    %127 = vector.broadcast %cst_50 : f32 to vector<8x128xf32>
    %128 = arith.addf %127, %126 : vector<8x128xf32>
    %129 = arith.divf %127, %128 : vector<8x128xf32>
    %130 = math.tanh %124 : vector<8x128xf32>
    %131 = vector.extract_strided_slice %129 {offsets = [0, 0], sizes = [8, 32], strides = [1, 1]} : vector<8x128xf32> to vector<8x32xf32>
    %132 = vector.extract_strided_slice %129 {offsets = [0, 32], sizes = [8, 32], strides = [1, 1]} : vector<8x128xf32> to vector<8x32xf32>
    %133 = vector.extract_strided_slice %130 {offsets = [0, 64], sizes = [8, 32], strides = [1, 1]} : vector<8x128xf32> to vector<8x32xf32>
    %134 = vector.extract_strided_slice %129 {offsets = [0, 96], sizes = [8, 32], strides = [1, 1]} : vector<8x128xf32> to vector<8x32xf32>
    %135 = arith.mulf %132, %120 : vector<8x32xf32>
    %136 = arith.mulf %131, %133 : vector<8x32xf32>
    %137 = arith.addf %135, %136 : vector<8x32xf32>
    %138 = math.tanh %137 : vector<8x32xf32>
    %139 = arith.mulf %134, %138 : vector<8x32xf32>
    %140 = arith.index_cast %114 : i32 to index
    %c0_51 = arith.constant 0 : index
    %141 = vector.load %arg19[%140, %c0_51] : memref<64x32xf32, #tpu.memory_space<vmem>>, vector<8x32xf32>
    tpu.vector_store %arg19[%140, %c0_51], %139 {strides = array<i32>} : memref<64x32xf32, #tpu.memory_space<vmem>>, vector<8x32xf32>,
    %c4_i32 = arith.constant 4 : i32
    %c8_i32_52 = arith.constant 8 : i32
    %142 = arith.muli %c4_i32, %c8_i32_52 : i32
    %143 = tpu.assume_multiple %142, 8 : i32
    %144 = arith.index_cast %143 : i32 to index
    %c0_53 = arith.constant 0 : index
    %145 = vector.load %arg2[%144, %c0_53] : memref<64x1xf32, #tpu.memory_space<vmem>>, vector<8x1xf32>
    %146 = vector.broadcast %145 : vector<8x1xf32> to vector<8x32xf32>
    %147 = arith.mulf %139, %146 : vector<8x32xf32>
    %148 = vector.broadcast %145 : vector<8x1xf32> to vector<8x32xf32>
    %149 = arith.mulf %137, %148 : vector<8x32xf32>
    %150 = arith.index_cast %143 : i32 to index
    %c0_54 = arith.constant 0 : index
    %151 = vector.load %arg18[%150, %c0_54] : memref<64x128xf32, #tpu.memory_space<vmem>>, vector<8x128xf32>
    %cst_55 = arith.constant dense<0.000000e+00> : vector<8x128xf32>
    %152 = tpu.matmul %147, %23, %cst_55 {dimension_numbers = #tpu.dot_dimension_numbers<[1], [0], [0], [1], [0, 0, 1, 1], [], []>} : vector<8x32xf32>, vector<32x128xf32>, vector<8x128xf32> -> vector<8x128xf32>
    %153 = arith.addf %151, %152 : vector<8x128xf32>
    %154 = arith.negf %153 : vector<8x128xf32>
    %155 = math.exp %154 : vector<8x128xf32>
    %cst_56 = arith.constant 1.000000e+00 : f32
    %156 = vector.broadcast %cst_56 : f32 to vector<8x128xf32>
    %157 = arith.addf %156, %155 : vector<8x128xf32>
    %158 = arith.divf %156, %157 : vector<8x128xf32>
    %159 = math.tanh %153 : vector<8x128xf32>
    %160 = vector.extract_strided_slice %158 {offsets = [0, 0], sizes = [8, 32], strides = [1, 1]} : vector<8x128xf32> to vector<8x32xf32>
    %161 = vector.extract_strided_slice %158 {offsets = [0, 32], sizes = [8, 32], strides = [1, 1]} : vector<8x128xf32> to vector<8x32xf32>
    %162 = vector.extract_strided_slice %159 {offsets = [0, 64], sizes = [8, 32], strides = [1, 1]} : vector<8x128xf32> to vector<8x32xf32>
    %163 = vector.extract_strided_slice %158 {offsets = [0, 96], sizes = [8, 32], strides = [1, 1]} : vector<8x128xf32> to vector<8x32xf32>
    %164 = arith.mulf %161, %149 : vector<8x32xf32>
    %165 = arith.mulf %160, %162 : vector<8x32xf32>
    %166 = arith.addf %164, %165 : vector<8x32xf32>
    %167 = math.tanh %166 : vector<8x32xf32>
    %168 = arith.mulf %163, %167 : vector<8x32xf32>
    %169 = arith.index_cast %143 : i32 to index
    %c0_57 = arith.constant 0 : index
    %170 = vector.load %arg19[%169, %c0_57] : memref<64x32xf32, #tpu.memory_space<vmem>>, vector<8x32xf32>
    tpu.vector_store %arg19[%169, %c0_57], %168 {strides = array<i32>} : memref<64x32xf32, #tpu.memory_space<vmem>>, vector<8x32xf32>,
    %c5_i32 = arith.constant 5 : i32
    %c8_i32_58 = arith.constant 8 : i32
    %171 = arith.muli %c5_i32, %c8_i32_58 : i32
    %172 = tpu.assume_multiple %171, 8 : i32
    %173 = arith.index_cast %172 : i32 to index
    %c0_59 = arith.constant 0 : index
    %174 = vector.load %arg2[%173, %c0_59] : memref<64x1xf32, #tpu.memory_space<vmem>>, vector<8x1xf32>
    %175 = vector.broadcast %174 : vector<8x1xf32> to vector<8x32xf32>
    %176 = arith.mulf %168, %175 : vector<8x32xf32>
    %177 = vector.broadcast %174 : vector<8x1xf32> to vector<8x32xf32>
    %178 = arith.mulf %166, %177 : vector<8x32xf32>
    %179 = arith.index_cast %172 : i32 to index
    %c0_60 = arith.constant 0 : index
    %180 = vector.load %arg18[%179, %c0_60] : memref<64x128xf32, #tpu.memory_space<vmem>>, vector<8x128xf32>
    %cst_61 = arith.constant dense<0.000000e+00> : vector<8x128xf32>
    %181 = tpu.matmul %176, %23, %cst_61 {dimension_numbers = #tpu.dot_dimension_numbers<[1], [0], [0], [1], [0, 0, 1, 1], [], []>} : vector<8x32xf32>, vector<32x128xf32>, vector<8x128xf32> -> vector<8x128xf32>
    %182 = arith.addf %180, %181 : vector<8x128xf32>
    %183 = arith.negf %182 : vector<8x128xf32>
    %184 = math.exp %183 : vector<8x128xf32>
    %cst_62 = arith.constant 1.000000e+00 : f32
    %185 = vector.broadcast %cst_62 : f32 to vector<8x128xf32>
    %186 = arith.addf %185, %184 : vector<8x128xf32>
    %187 = arith.divf %185, %186 : vector<8x128xf32>
    %188 = math.tanh %182 : vector<8x128xf32>
    %189 = vector.extract_strided_slice %187 {offsets = [0, 0], sizes = [8, 32], strides = [1, 1]} : vector<8x128xf32> to vector<8x32xf32>
    %190 = vector.extract_strided_slice %187 {offsets = [0, 32], sizes = [8, 32], strides = [1, 1]} : vector<8x128xf32> to vector<8x32xf32>
    %191 = vector.extract_strided_slice %188 {offsets = [0, 64], sizes = [8, 32], strides = [1, 1]} : vector<8x128xf32> to vector<8x32xf32>
    %192 = vector.extract_strided_slice %187 {offsets = [0, 96], sizes = [8, 32], strides = [1, 1]} : vector<8x128xf32> to vector<8x32xf32>
    %193 = arith.mulf %190, %178 : vector<8x32xf32>
    %194 = arith.mulf %189, %191 : vector<8x32xf32>
    %195 = arith.addf %193, %194 : vector<8x32xf32>
    %196 = math.tanh %195 : vector<8x32xf32>
    %197 = arith.mulf %192, %196 : vector<8x32xf32>
    %198 = arith.index_cast %172 : i32 to index
    %c0_63 = arith.constant 0 : index
    %199 = vector.load %arg19[%198, %c0_63] : memref<64x32xf32, #tpu.memory_space<vmem>>, vector<8x32xf32>
    tpu.vector_store %arg19[%198, %c0_63], %197 {strides = array<i32>} : memref<64x32xf32, #tpu.memory_space<vmem>>, vector<8x32xf32>,
    %c6_i32 = arith.constant 6 : i32
    %c8_i32_64 = arith.constant 8 : i32
    %200 = arith.muli %c6_i32, %c8_i32_64 : i32
    %201 = tpu.assume_multiple %200, 8 : i32
    %202 = arith.index_cast %201 : i32 to index
    %c0_65 = arith.constant 0 : index
    %203 = vector.load %arg2[%202, %c0_65] : memref<64x1xf32, #tpu.memory_space<vmem>>, vector<8x1xf32>
    %204 = vector.broadcast %203 : vector<8x1xf32> to vector<8x32xf32>
    %205 = arith.mulf %197, %204 : vector<8x32xf32>
    %206 = vector.broadcast %203 : vector<8x1xf32> to vector<8x32xf32>
    %207 = arith.mulf %195, %206 : vector<8x32xf32>
    %208 = arith.index_cast %201 : i32 to index
    %c0_66 = arith.constant 0 : index
    %209 = vector.load %arg18[%208, %c0_66] : memref<64x128xf32, #tpu.memory_space<vmem>>, vector<8x128xf32>
    %cst_67 = arith.constant dense<0.000000e+00> : vector<8x128xf32>
    %210 = tpu.matmul %205, %23, %cst_67 {dimension_numbers = #tpu.dot_dimension_numbers<[1], [0], [0], [1], [0, 0, 1, 1], [], []>} : vector<8x32xf32>, vector<32x128xf32>, vector<8x128xf32> -> vector<8x128xf32>
    %211 = arith.addf %209, %210 : vector<8x128xf32>
    %212 = arith.negf %211 : vector<8x128xf32>
    %213 = math.exp %212 : vector<8x128xf32>
    %cst_68 = arith.constant 1.000000e+00 : f32
    %214 = vector.broadcast %cst_68 : f32 to vector<8x128xf32>
    %215 = arith.addf %214, %213 : vector<8x128xf32>
    %216 = arith.divf %214, %215 : vector<8x128xf32>
    %217 = math.tanh %211 : vector<8x128xf32>
    %218 = vector.extract_strided_slice %216 {offsets = [0, 0], sizes = [8, 32], strides = [1, 1]} : vector<8x128xf32> to vector<8x32xf32>
    %219 = vector.extract_strided_slice %216 {offsets = [0, 32], sizes = [8, 32], strides = [1, 1]} : vector<8x128xf32> to vector<8x32xf32>
    %220 = vector.extract_strided_slice %217 {offsets = [0, 64], sizes = [8, 32], strides = [1, 1]} : vector<8x128xf32> to vector<8x32xf32>
    %221 = vector.extract_strided_slice %216 {offsets = [0, 96], sizes = [8, 32], strides = [1, 1]} : vector<8x128xf32> to vector<8x32xf32>
    %222 = arith.mulf %219, %207 : vector<8x32xf32>
    %223 = arith.mulf %218, %220 : vector<8x32xf32>
    %224 = arith.addf %222, %223 : vector<8x32xf32>
    %225 = math.tanh %224 : vector<8x32xf32>
    %226 = arith.mulf %221, %225 : vector<8x32xf32>
    %227 = arith.index_cast %201 : i32 to index
    %c0_69 = arith.constant 0 : index
    %228 = vector.load %arg19[%227, %c0_69] : memref<64x32xf32, #tpu.memory_space<vmem>>, vector<8x32xf32>
    tpu.vector_store %arg19[%227, %c0_69], %226 {strides = array<i32>} : memref<64x32xf32, #tpu.memory_space<vmem>>, vector<8x32xf32>,
    %c7_i32 = arith.constant 7 : i32
    %c8_i32_70 = arith.constant 8 : i32
    %229 = arith.muli %c7_i32, %c8_i32_70 : i32
    %230 = tpu.assume_multiple %229, 8 : i32
    %231 = arith.index_cast %230 : i32 to index
    %c0_71 = arith.constant 0 : index
    %232 = vector.load %arg2[%231, %c0_71] : memref<64x1xf32, #tpu.memory_space<vmem>>, vector<8x1xf32>
    %233 = vector.broadcast %232 : vector<8x1xf32> to vector<8x32xf32>
    %234 = arith.mulf %226, %233 : vector<8x32xf32>
    %235 = vector.broadcast %232 : vector<8x1xf32> to vector<8x32xf32>
    %236 = arith.mulf %224, %235 : vector<8x32xf32>
    %237 = arith.index_cast %230 : i32 to index
    %c0_72 = arith.constant 0 : index
    %238 = vector.load %arg18[%237, %c0_72] : memref<64x128xf32, #tpu.memory_space<vmem>>, vector<8x128xf32>
    %cst_73 = arith.constant dense<0.000000e+00> : vector<8x128xf32>
    %239 = tpu.matmul %234, %23, %cst_73 {dimension_numbers = #tpu.dot_dimension_numbers<[1], [0], [0], [1], [0, 0, 1, 1], [], []>} : vector<8x32xf32>, vector<32x128xf32>, vector<8x128xf32> -> vector<8x128xf32>
    %240 = arith.addf %238, %239 : vector<8x128xf32>
    %241 = arith.negf %240 : vector<8x128xf32>
    %242 = math.exp %241 : vector<8x128xf32>
    %cst_74 = arith.constant 1.000000e+00 : f32
    %243 = vector.broadcast %cst_74 : f32 to vector<8x128xf32>
    %244 = arith.addf %243, %242 : vector<8x128xf32>
    %245 = arith.divf %243, %244 : vector<8x128xf32>
    %246 = math.tanh %240 : vector<8x128xf32>
    %247 = vector.extract_strided_slice %245 {offsets = [0, 0], sizes = [8, 32], strides = [1, 1]} : vector<8x128xf32> to vector<8x32xf32>
    %248 = vector.extract_strided_slice %245 {offsets = [0, 32], sizes = [8, 32], strides = [1, 1]} : vector<8x128xf32> to vector<8x32xf32>
    %249 = vector.extract_strided_slice %246 {offsets = [0, 64], sizes = [8, 32], strides = [1, 1]} : vector<8x128xf32> to vector<8x32xf32>
    %250 = vector.extract_strided_slice %245 {offsets = [0, 96], sizes = [8, 32], strides = [1, 1]} : vector<8x128xf32> to vector<8x32xf32>
    %251 = arith.mulf %248, %236 : vector<8x32xf32>
    %252 = arith.mulf %247, %249 : vector<8x32xf32>
    %253 = arith.addf %251, %252 : vector<8x32xf32>
    %254 = math.tanh %253 : vector<8x32xf32>
    %255 = arith.mulf %250, %254 : vector<8x32xf32>
    %256 = arith.index_cast %230 : i32 to index
    %c0_75 = arith.constant 0 : index
    %257 = vector.load %arg19[%256, %c0_75] : memref<64x32xf32, #tpu.memory_space<vmem>>, vector<8x32xf32>
    tpu.vector_store %arg19[%256, %c0_75], %255 {strides = array<i32>} : memref<64x32xf32, #tpu.memory_space<vmem>>, vector<8x32xf32>,
    %c8_i32_76 = arith.constant 8 : i32
    %c0_77 = arith.constant 0 : index
    %c0_78 = arith.constant 0 : index
    %258 = vector.load %arg16[%c0_77, %c0_78] : memref<8x32xf32, #tpu.memory_space<vmem>>, vector<8x32xf32>
    tpu.vector_store %arg16[%c0_77, %c0_78], %255 {strides = array<i32>} : memref<8x32xf32, #tpu.memory_space<vmem>>, vector<8x32xf32>,
    %c0_79 = arith.constant 0 : index
    %c0_80 = arith.constant 0 : index
    %259 = vector.load %arg17[%c0_79, %c0_80] : memref<8x32xf32, #tpu.memory_space<vmem>>, vector<8x32xf32>
    tpu.vector_store %arg17[%c0_79, %c0_80], %253 {strides = array<i32>} : memref<8x32xf32, #tpu.memory_space<vmem>>, vector<8x32xf32>,
    %c0_81 = arith.constant 0 : index
    %c0_82 = arith.constant 0 : index
    %260 = vector.load %arg19[%c0_81, %c0_82] : memref<64x32xf32, #tpu.memory_space<vmem>>, vector<64x32xf32>
    %c0_83 = arith.constant 0 : index
    %c0_84 = arith.constant 0 : index
    %261 = vector.load %arg13[%c0_83, %c0_84] : memref<1x32xf32, #tpu.memory_space<vmem>>, vector<1x32xf32>
    %262 = vector.broadcast %261 : vector<1x32xf32> to vector<64x32xf32>
    %263 = arith.mulf %260, %262 : vector<64x32xf32>
    %cst_85 = arith.constant dense<0.000000e+00> : vector<64xf32>
    %264 = vector.multi_reduction <add>, %263, %cst_85 [1] : vector<64x32xf32> to vector<64xf32>
    %265 = vector.shape_cast %264 : vector<64xf32> to vector<64x1xf32>
    %c0_86 = arith.constant 0 : index
    %c0_87 = arith.constant 0 : index
    %266 = vector.load %arg14[%c0_86, %c0_87] : memref<1x1xf32, #tpu.memory_space<vmem>>, vector<1x1xf32>
    %267 = vector.broadcast %266 : vector<1x1xf32> to vector<64x1xf32>
    %268 = arith.addf %265, %267 : vector<64x1xf32>
    %c0_88 = arith.constant 0 : index
    %c0_89 = arith.constant 0 : index
    %269 = vector.load %arg15[%c0_88, %c0_89] : memref<64x1xf32, #tpu.memory_space<vmem>>, vector<64x1xf32>
    tpu.vector_store %arg15[%c0_88, %c0_89], %268 {strides = array<i32>} : memref<64x1xf32, #tpu.memory_space<vmem>>, vector<64x1xf32>,
    return
  }
}

</mosaic_0001>

<bundles_post_ra>
// kernel: tpu_custom_call.1
= control target key start
LH: loop header
LB: loop body
LE: loop exit
PB: predicated region body
PF: predicated region fallthrough
CT: control target
= control target key end

     0   :  { %s2707_s0 = inlined_call_operand.vmem [shape: f32[64,24], index: 0, kind: input, shape index: {}]   ;;  %s2708_s1 = inlined_call_operand.vmem [shape: f32[64,4], index: 1, kind: input, shape index: {}]   ;;  %s2709_s2 = inlined_call_operand.vmem [shape: f32[64,1], index: 2, kind: input, shape index: {}]   ;;  %s2710_s3 = inlined_call_operand.vmem [shape: f32[8,32], index: 3, kind: input, shape index: {}]   ;;  %s2711_s4 = inlined_call_operand.vmem [shape: f32[8,32], index: 4, kind: input, shape index: {}]   ;;  %s2712_s5 = inlined_call_operand.vmem [shape: f32[24,32], index: 5, kind: input, shape index: {}]   ;;  %s2713_s6 = inlined_call_operand.vmem [shape: f32[32,32], index: 6, kind: input, shape index: {}]   ;;  %s2714_s7 = inlined_call_operand.vmem [shape: f32[4,128], index: 7, kind: input, shape index: {}]   ;;  %s2715_s8 = inlined_call_operand.vmem [shape: f32[32,128], index: 8, kind: input, shape index: {}]   ;;  %s2716_s9 = inlined_call_operand.vmem [shape: f32[32,128], index: 9, kind: input, shape index: {}]   ;;  %s2717_s10 = inlined_call_operand.vmem [shape: f32[1,32], index: 10, kind: input, shape index: {}]   ;;  %s2718_s11 = inlined_call_operand.vmem [shape: f32[1,32], index: 11, kind: input, shape index: {}]   ;;  %s2719_s12 = inlined_call_operand.vmem [shape: f32[1,128], index: 12, kind: input, shape index: {}]   ;;  %s2720_s13 = inlined_call_operand.vmem [shape: f32[1,32], index: 13, kind: input, shape index: {}]   ;;  %s2721_s14 = inlined_call_operand.<no memory space> [shape: f32[1,1], index: 14, kind: input, shape index: {}]   ;;  %s2722_s15 = inlined_call_operand.vmem [shape: f32[64,1], index: 15, kind: output, shape index: {0}]   ;;  %s2723_s16 = inlined_call_operand.hbm [shape: f32[8,32], index: 16, kind: output, shape index: {1}]   ;;  %s2724_s17 = inlined_call_operand.hbm [shape: f32[8,32], index: 17, kind: output, shape index: {2}]  }
   0x1   :  { %2727 = sst [smem:[#allocation11_spill]] %s2707_s0  ;;  %v23_v0 = vstv %s2721_s14 }
   0x2   :  { %2728 = sst [smem:[#allocation12_spill]] %s2708_s1  ;;  %24 = vst [vmem:[#allocation4] sm:$0x1] %v23_v0 }
   0x3   :  { %25 = vsyncpa [#allocation6], 0  ;;  %v73_v1 = vld [vmem:[%s2712_s5] sm:$0xff]  ;;  %v74_v2 = vld [vmem:[%s2712_s5 + $0x8] sm:$0xff]  ;;  %vm83_vm0 = vcmask 195584   ;;  %s2729_s18 = sld [smem:[#allocation11_spill]] }
   0x4   :  { %v2008_v3 = vpack.c.bf16 %v74_v2, %v73_v1  ;;  %v75_v5 = vld [vmem:[%s2712_s5 + $0x10] sm:$0xff]  ;;  %v221_v6 = vld [vmem:[%s2713_s6] sm:$0xff]  ;;  %v222_v7 = vld [vmem:[%s2713_s6 + $0x8] sm:$0xff] }
   0x6   :  { %2009 = vmatprep.subr.bf16.mxu0 %v2008_v3 }
   0x7   :  { %2011 = vmatpush3.bf16.msra.mxu0 %v2008_v3 }
   0x9   :  { %v57_v4 = vld [vmem:[%s2729_s18] sm:$0xff] }
   0xa   :  { %1854 = vmatprep.mubr.msk.f32.mxu0 %vm83_vm0, %v57_v4 }
   0xb   :  { %26 = vsyncpa [#allocation8], 0  ;;  %1852 = vmatprep.subr.mxu0 %v75_v5  ;;  %v2012_v8 = vpack.c.bf16 %v222_v7, %v221_v6  ;;  %v58_v9 = vld [vmem:[%s2729_s18 + $0x8] sm:$0xff]  ;;  %v59_v10 = vld [vmem:[%s2729_s18 + $0x10] sm:$0xff]  ;;  %v2207_v22 = vmov 0   ;;  %vm232_vm1 = vcmask 261120  }
   0xc   :  { %1853 = vmatpush3.msra.mxu0 %v75_v5  ;;  %v60_v11 = vld [vmem:[%s2729_s18 + $0x18] sm:$0xff]  ;;  %v61_v12 = vld [vmem:[%s2729_s18 + $0x20] sm:$0xff]  ;;  %v62_v13 = vld [vmem:[%s2729_s18 + $0x28] sm:$0xff]  ;;  %2093 = vset.pattern.permute.xlu0 %v2207_v22  ;;  %vm521_vm2 = vcmask 1043456   ;;  %v2208_v53 = vmov 0.0|0.0   ;;  %vm2209_vm3 = vmmov 0  }
   0xd   :  { %2013 = vmatprep.subr.bf16.mxu1 %v2012_v8  ;;  %1855 = vmatmul.mubr.msk.f32.vlgmr.msra.gmra.mrb[0].mxu0 %vm83_vm0, %v58_v9  ;;  %v63_v14 = vld [vmem:[%s2729_s18 + $0x30] sm:$0xff]  ;;  %v64_v15 = vld [vmem:[%s2729_s18 + $0x38] sm:$0xff]  ;;  %v659_v19 = vld [vmem:[%s2709_s2] sm:$0xff]  ;;  %v2210_v0 = vmov 0.0   ;;  %s2730_s29 = sld [smem:[#allocation12_spill]]  ;;  %vm496_vm4 = vcmask 31744  }
   0xe   :  { %2015 = vmatpush3.bf16.msra.mxu1 %v2012_v8  ;;  %1857 = vmatprep.mubr.msk.f32.mxu0 %vm83_vm0, %v59_v10  ;;  %v223_v16 = vld [vmem:[%s2713_s6 + $0x10] sm:$0xff]  ;;  %v224_v17 = vld [vmem:[%s2713_s6 + $0x18] sm:$0xff]  ;;  %v363_v20 = vld [vmem:[%s2715_s8] sm:$0xff]  ;;  %vm1662_vm5 = vcmask 7168   ;;  %s2213_s21 = smov 96   ;;  %s2214_s22 = smov [#allocation5]  }
   0xf   :  { %v2016_v18 = vpack.c.bf16 %v224_v17, %v223_v16  ;;  %v364_v21 = vld [vmem:[%s2715_s8 + $0x8] sm:$0xff]  ;;  %v365_v24 = vld [vmem:[%s2715_s8 + $0x10] sm:$0xff]  ;;  %v366_v25 = vld [vmem:[%s2715_s8 + $0x18] sm:$0xff]  ;;  %2094 = vset.pattern.permute.xlu1 %v2207_v22  ;;  %662 = vperm.xlu0 %2093, %v659_v19  }
  0x10   :  { %v2020_v23 = vpack.c.bf16 %v364_v21, %v363_v20  ;;  %v2024_v26 = vpack.c.bf16 %v366_v25, %v365_v24  ;;  %v1703_v27 = vld [vmem:[%s2717_s10] ss:$0 sm:$0xff]  ;;  %v654_v55 = vld [vmem:[%s2716_s9 + $0x8] sm:$0xff]  ;;  %v655_v57 = vld [vmem:[%s2716_s9 + $0x10] sm:$0xff] }
  0x11   :  { %1858 = vmatmul.mubr.msk.f32.gmra.mrb[2].mxu0 %vm83_vm0, %v60_v11  ;;  %2017 = vmatprep.subr.bf16.mxu1 %v2016_v18  ;;  %v362_v52 = vld [vmem:[%s2714_s7] sm:$0xf]  ;;  %v656_v58 = vld [vmem:[%s2716_s9 + $0x18] sm:$0xff]  ;;  %s1679_s7 = sshll.u32 %s2214_s22, 4  ;;  %s1680_s7 = int_to_ptr.vmem [resolvable:$true] %s1679_s7 }
  0x12   :  { %1860 = vmatprep.mubr.msk.f32.mxu0 %vm83_vm0, %v61_v12  ;;  %2019 = vmatpush3.bf16.msra.mxu1 %v2016_v18  ;;  %v653_v54 = vld [vmem:[%s2716_s9] sm:$0xff]  ;;  %v2409_v59 = vpack.c.bf16 %v656_v58, %v655_v57  ;;  %s2211_s9 = smov 32   ;;  %s2159_s23 = scalar_lea.vmem %s1680_s7, 128 }
  0x13   :  { %2021 = vmatprep.subr.bf16.mxu0 %v2020_v23  ;;  %2028 = vmatprep.subr.bf16.mxu1 %v2208_v53  ;;  %v2399_v56 = vpack.c.bf16 %v654_v55, %v653_v54  ;;  %v657_v61 = vld [vmem:[%s2710_s3] sm:$0xff]  ;;  %v66_v20 = vld [vmem:[%s2730_s29 + $0x8] sm:$0xff]  ;;  %v67_v21 = vld [vmem:[%s2730_s29 + $0x10] sm:$0xff]  ;;  %p2160_p0 = scmp.ne.s32.totalorder %s1680_s7, %s2159_s23  ;;  %p2164_p1 = scmp.lt.s32.totalorder %s1680_s7, %s1680_s7 }
  0x14   :  { %2023 = vmatpush3.bf16.msra.mxu0 %v2020_v23  ;;  %v658_v63 = vld [vmem:[%s2711_s4] sm:$0xff]  ;;  %v68_v22 = vld [vmem:[%s2730_s29 + $0x18] sm:$0xff]  ;;  %v70_v24 = vld [vmem:[%s2730_s29 + $0x28] sm:$0xff]  ;;  %p2165_p2 = scmp.lt.s32.totalorder %s2159_s23, %s2159_s23 }
  0x15   :  { %1861 = vmatmul.mubr.msk.f32.gmra.mrb[4].mxu0 %vm83_vm0, %v62_v13  ;;  %2025 = vmatprep.subr.bf16.mxu0 %v2024_v26  ;;  %v1712_v2 = vld [vmem:[%s2718_s11] ss:$0 sm:$0xff]  ;;  %v71_v25 = vld [vmem:[%s2730_s29 + $0x30] sm:$0xff] }
  0x16   :  { %1863 = vmatprep.mubr.msk.f32.mxu0 %vm83_vm0, %v63_v14  ;;  %v65_v19 = vld [vmem:[%s2730_s29] sm:$0xff]  ;;  %p2166_p3 = por %p2165_p2, %p2164_p1 }
  0x17   :  { %v69_v23 = vld [vmem:[%s2730_s29 + $0x20] sm:$0xff] }
  0x18   :  { %2027 = vmatpush3.bf16.msra.mxu0 %v2024_v26  ;;  %v72_v26 = vld [vmem:[%s2730_s29 + $0x38] sm:$0xff]  ;;  %p2167_p4 = pnand %p2166_p3, %p2160_p0 }
  0x19   :  { %1864 = vmatmul.mubr.msk.f32.gmra.mrb[6].mxu0 %vm83_vm0, %v64_v15  ;;  %1906 = vmatprep.subr.msk.mxu0 %vm521_vm2, %v362_v52 }
  0x8e   :  { %v663_v60 = vpop.permute.xlu0 %662 }
  0x8f   :  { %v665_v62 = vmul.f32 %v663_v60, %v657_v61  ;;  %v666_v1 = vmul.f32 %v663_v60, %v658_v63 }
  0x91   :  { %750 = vrot.lane.b32.xlu1 %v666_v1, %s2211_s9 }
  0xe0   :  { %v1856_v28 = vpop.f32.mrb[0].mxu0 }
  0xe1   :  { %v180_v29 = vadd.f32 %v1856_v28, %v1703_v27  ;;  %v174_v30 = vpop.f32.mrb[1].mxu0 }
  0xe2   :  { %v175_v31 = vadd.f32 %v1703_v27, %v174_v30 }
  0xe3   :  { %v214_v34 = vmax.f32 %v180_v29, 0.0  ;;  %v1738_v29 = vld [vmem:[%s2719_s12] ss:$0 sm:$0xff]  ;;  %s2212_s12 = smov 64  }
  0xe4   :  { %v213_v32 = vmax.f32 %v175_v31, 0.0  ;;  %v1859_v33 = vpop.f32.mrb[2].mxu0 }
  0xe5   :  { %v190_v35 = vadd.f32 %v1859_v33, %v1703_v27  ;;  %v184_v36 = vpop.f32.mrb[3].mxu0 }
  0xe6   :  { %v185_v37 = vadd.f32 %v1703_v27, %v184_v36  ;;  %1874 = vmatprep.mubr.msk.f32.mxu1 %vm232_vm1, %v213_v32 }
  0xe7   :  { %1875 = vmatmul.mubr.msk.f32.vlgmr.msra.gmra.mrb[0].mxu1 %vm232_vm1, %v214_v34  ;;  %v216_v40 = vmax.f32 %v190_v35, 0.0 }
  0xe8   :  { %v215_v38 = vmax.f32 %v185_v37, 0.0  ;;  %v1862_v39 = vpop.f32.mrb[4].mxu0  ;;  %2030 = vmatpush3.bf16.msra.mxu1 %v2399_v56 }
  0xe9   :  { %v200_v41 = vadd.f32 %v1862_v39, %v1703_v27  ;;  %v194_v42 = vpop.f32.mrb[5].mxu0  ;;  %2031 = vmatprep.subr.bf16.mxu1 %v2208_v53 }
  0xea   :  { %v195_v43 = vadd.f32 %v1703_v27, %v194_v42  ;;  %1877 = vmatprep.mubr.msk.f32.mxu1 %vm232_vm1, %v215_v38 }
  0xeb   :  { %1878 = vmatmul.mubr.msk.f32.gmra.mrb[2].mxu1 %vm232_vm1, %v216_v40  ;;  %v218_v46 = vmax.f32 %v200_v41, 0.0 }
  0xec   :  { %v217_v44 = vmax.f32 %v195_v43, 0.0  ;;  %v1865_v45 = vpop.f32.mrb[6].mxu0  ;;  %2033 = vmatpush3.bf16.msra.mxu1 %v2409_v59 }
  0xed   :  { %v210_v47 = vadd.f32 %v1865_v45, %v1703_v27  ;;  %v204_v48 = vpop.f32.mrb[7].mxu0  ;;  %2034 = vmatprep.subr.bf16.mxu1 %v2208_v53 }
  0xee   :  { %v205_v49 = vadd.f32 %v1703_v27, %v204_v48  ;;  %1880 = vmatprep.mubr.msk.f32.mxu1 %vm232_vm1, %v217_v44  ;;  %v1741_v48 = vld [vmem:[%s2709_s2 + $0x8] sm:$0xff] }
  0xef   :  { %1881 = vmatmul.mubr.msk.f32.gmra.mrb[4].mxu1 %vm232_vm1, %v218_v46  ;;  %v220_v51 = vmax.f32 %v210_v47, 0.0 }
  0xf0   :  { %v219_v50 = vmax.f32 %v205_v49, 0.0 }
  0xf2   :  { %1883 = vmatprep.mubr.msk.f32.mxu1 %vm232_vm1, %v219_v50 }
  0xf3   :  { %1884 = vmatmul.mubr.msk.f32.gmra.mrb[6].mxu1 %vm232_vm1, %v220_v51 }
  0xf4   :  { %1928 = vmatprep.mubr.msk.f32.mxu1 %vm2209_vm3, %v2210_v0 }
  0xf7   :  { %1929 = vmatmul.mubr.msk.f32.vlgmr.msra.gmra.mrb[8].mxu1 %vm232_vm1, %v665_v62 }
  0xf8   :  { %2036 = vmatpush3.bf16.msra.mxu1 %v2399_v56  ;;  %1939 = vmatprep.mubr.msk.f32.mxu1 %vm2209_vm3, %v2210_v0 }
  0xf9   :  { %2037 = vmatprep.subr.bf16.mxu1 %v2208_v53 }
  0xfc   :  { %2039 = vmatpush3.bf16.msra.mxu1 %v2409_v59 }
  0xfd   :  { %2040 = vmatprep.subr.bf16.mxu1 %v2208_v53 }
 0x103   :  { %v751_v57 = vpop.permute.xlu1 %750 }
 0x1ba   :  { %v1876_v3 = vpop.f32.mrb[0].mxu1 }
 0x1bb   :  { %v323_v4 = vpop.f32.mrb[1].mxu1  ;;  %v329_v6 = vadd.f32 %v1876_v3, %v1712_v2 }
 0x1bc   :  { %v324_v5 = vadd.f32 %v1712_v2, %v323_v4 }
 0x1be   :  { %v1879_v7 = vpop.f32.mrb[2].mxu1  ;;  %1894 = vmatprep.mubr.msk.f32.mxu0 %vm232_vm1, %v324_v5 }
 0x1bf   :  { %v333_v8 = vpop.f32.mrb[3].mxu1  ;;  %1895 = vmatmul.mubr.msk.f32.vlgmr.msra.gmra.mrb[8].mxu0 %vm232_vm1, %v329_v6  ;;  %v339_v10 = vadd.f32 %v1879_v7, %v1712_v2 }
 0x1c0   :  { %v334_v9 = vadd.f32 %v1712_v2, %v333_v8  ;;  %1907 = vmatpush3.msk.msra.mxu0 %vm521_vm2, %v362_v52 }
 0x1c1   :  { %2052 = vmatprep.subr.bf16.mxu0 %v2208_v53 }
 0x1c2   :  { %v1882_v11 = vpop.f32.mrb[4].mxu1  ;;  %1897 = vmatprep.mubr.msk.f32.mxu0 %vm232_vm1, %v334_v9  ;;  %v1744_v9 = vld [vmem:[%s2709_s2 + $0x10] sm:$0xff] }
 0x1c3   :  { %v343_v12 = vpop.f32.mrb[5].mxu1  ;;  %1898 = vmatmul.mubr.msk.f32.gmra.mrb[10].mxu0 %vm232_vm1, %v339_v10  ;;  %v349_v14 = vadd.f32 %v1882_v11, %v1712_v2 }
 0x1c4   :  { %v344_v13 = vadd.f32 %v1712_v2, %v343_v12 }
 0x1c6   :  { %v1885_v15 = vpop.f32.mrb[6].mxu1  ;;  %1900 = vmatprep.mubr.msk.f32.mxu0 %vm232_vm1, %v344_v13 }
 0x1c7   :  { %v353_v16 = vpop.f32.mrb[7].mxu1  ;;  %1901 = vmatmul.mubr.msk.f32.gmra.mrb[12].mxu0 %vm232_vm1, %v349_v14  ;;  %v359_v18 = vadd.f32 %v1885_v15, %v1712_v2 }
 0x1c8   :  { %v354_v17 = vadd.f32 %v1712_v2, %v353_v16 }
 0x1ca   :  { %1903 = vmatprep.mubr.msk.f32.mxu0 %vm232_vm1, %v354_v17  ;;  %v737_v27 = vpop.f32.mrb[8].mxu1 }
 0x1cb   :  { %1904 = vmatmul.mubr.msk.f32.gmra.mrb[14].mxu0 %vm232_vm1, %v359_v18  ;;  %v1930_v28 = vpop.f32.mrb[9].mxu1 }
 0x1cc   :  { %1908 = vmatprep.mubr.msk.f32.mxu0 %vm496_vm4, %v65_v19 }
 0x1cf   :  { %1909 = vmatmul.mubr.msk.f32.vlgmr.msra.gmra.mrb[8].mxu0 %vm496_vm4, %v66_v20 }
 0x1d0   :  { %1911 = vmatprep.mubr.msk.f32.mxu0 %vm496_vm4, %v67_v21  ;;  %2054 = vmatpush3.bf16.msra.mxu0 %v2399_v56 }
 0x1d1   :  { %2055 = vmatprep.subr.bf16.mxu0 %v2208_v53 }
 0x1d3   :  { %1912 = vmatmul.mubr.msk.f32.gmra.mrb[10].mxu0 %vm496_vm4, %v68_v22 }
 0x1d4   :  { %1914 = vmatprep.mubr.msk.f32.mxu0 %vm496_vm4, %v69_v23  ;;  %2057 = vmatpush3.bf16.msra.mxu0 %v2409_v59 }
 0x1d5   :  { %2064 = vmatprep.subr.bf16.mxu0 %v2208_v53 }
 0x1d7   :  { %1915 = vmatmul.mubr.msk.f32.gmra.mrb[12].mxu0 %vm496_vm4, %v70_v24 }
 0x1d8   :  { %1917 = vmatprep.mubr.msk.f32.mxu0 %vm496_vm4, %v71_v25 }
 0x1db   :  { %1918 = vmatmul.mubr.msk.f32.gmra.mrb[14].mxu0 %vm496_vm4, %v72_v26 }
 0x1dc   :  { %1972 = vmatprep.mubr.msk.f32.mxu0 %vm2209_vm3, %v2210_v0 }
 0x2a2   :  { %v1910_v30 = vpop.f32.mrb[8].mxu0 }
 0x2a3   :  { %v638_v31 = vadd.f32 %v1910_v30, %v1738_v29  ;;  %v591_v32 = vpop.f32.mrb[9].mxu0  ;;  %v1747_v30 = vld [vmem:[%s2709_s2 + $0x18] sm:$0xff] }
 0x2a4   :  { %v637_v33 = vadd.f32 %v1738_v29, %v591_v32 }
 0x2a6   :  { %v741_v34 = vadd.f32 %v737_v27, %v637_v33  ;;  %v1913_v35 = vpop.f32.mrb[10].mxu0 }
 0x2a7   :  { %v2483_v36 = vadd.f32 %v1913_v35, %v1738_v29  ;;  %v601_v37 = vpop.f32.mrb[11].mxu0 }
 0x2a8   :  { %2095 = vtanh.f32 %v741_v34  ;;  %v2485_v38 = vadd.f32 %v1738_v29, %v601_v37  ;;  %v1740_v49 = vmul.f32 -1.442695, %v741_v34 }
 0x2aa   :  { %v1916_v39 = vpop.f32.mrb[12].mxu0  ;;  %2097 = vpow2.f32 %v1740_v49 }
 0x2ab   :  { %v2487_v40 = vadd.f32 %v1916_v39, %v1738_v29  ;;  %v611_v41 = vpop.f32.mrb[13].mxu0 }
 0x2ac   :  { %v2489_v42 = vadd.f32 %v1738_v29, %v611_v41 }
 0x2ae   :  { %v1919_v43 = vpop.f32.mrb[14].mxu0 }
 0x2af   :  { %v2491_v44 = vadd.f32 %v1919_v43, %v1738_v29  ;;  %v621_v45 = vpop.f32.mrb[15].mxu0 }
 0x2b0   :  { %v2493_v46 = vadd.f32 %v1738_v29, %v621_v45 }
 0x2b2   :  { %v2096_v47 = vpop.eup %2095 }
 0x2b3   :  { %755 = vrot.lane.b32.xlu0 %v2096_v47, %s2212_s12 }
 0x2b4   :  { %v2098_v50 = vpop.eup %2097 }
 0x2b5   :  { %v745_v51 = vadd.f32 1.0, %v2098_v50 }
 0x2b7   :  { %779 = vperm.xlu0 %2093, %v1741_v48   ;;  %2099 = vrcp.f32 %v745_v51 }
 0x2c1   :  { %v2100_v52 = vpop.eup %2099 }
 0x2c2   :  { %v753_v58 = vmul.f32 %v2100_v52, %v751_v57 }
 0x325   :  { %v756_v54 = vpop.permute.xlu0 %755 }
 0x326   :  { %v758_v55 = vmul.f32 %v2100_v52, %v756_v54 }
 0x328   :  { %760 = vrot.lane.b32.xlu1 %v758_v55, %s2211_s9 }
 0x336   :  { %v780_v2 = vpop.permute.xlu0 %779 }
 0x39a   :  { %v761_v60 = vpop.permute.xlu1 %760 }
 0x39b   :  { %v763_v61 = vadd.f32 %v761_v60, %v753_v58  ;;  %v1750_v58 = vld [vmem:[%s2709_s2 + $0x20] sm:$0xff] }
 0x39d   :  { %2101 = vtanh.f32 %v763_v61  ;;  %v783_v16 = vmul.f32 %v780_v2, %v763_v61 }
 0x3a7   :  { %v2102_v62 = vpop.eup %2101 }
 0x3a8   :  { %766 = vrot.lane.b32.xlu1 %v2102_v62, %s2212_s12 }
 0x41a   :  { %v767_v63 = vpop.permute.xlu1 %766 }
 0x41b   :  { %v2501_v1 = vmul.f32 %v2100_v52, %v767_v63 }
 0x41d   :  { %v782_v3 = vmul.f32 %v780_v2, %v2501_v1 }
 0x41f   :  { %787 = vrot.lane.b32.xlu0 %v782_v3, %s2211_s9 }
 0x491   :  { %v788_v4 = vpop.permute.xlu0 %787 }
 0x492   :  { %1940 = vmatmul.mubr.msk.f32.vlgmr.msra.gmra.mrb[10].mxu1 %vm232_vm1, %v788_v4 }
 0x493   :  { %2042 = vmatpush3.bf16.msra.mxu1 %v2399_v56  ;;  %1950 = vmatprep.mubr.msk.f32.mxu1 %vm2209_vm3, %v2210_v0 }
 0x494   :  { %2043 = vmatprep.subr.bf16.mxu1 %v2208_v53 }
 0x497   :  { %2045 = vmatpush3.bf16.msra.mxu1 %v2409_v59 }
 0x498   :  { %2046 = vmatprep.subr.bf16.mxu1 %v2208_v53 }
 0x565   :  { %v857_v5 = vpop.f32.mrb[10].mxu1 }
 0x566   :  { %v861_v6 = vadd.f32 %v857_v5, %v638_v31  ;;  %v1941_v7 = vpop.f32.mrb[11].mxu1 }
 0x568   :  { %2103 = vtanh.f32 %v861_v6  ;;  %v1743_v10 = vmul.f32 -1.442695, %v861_v6 }
 0x56a   :  { %2105 = vpow2.f32 %v1743_v10 }
 0x572   :  { %v2104_v8 = vpop.eup %2103 }
 0x573   :  { %871 = vrot.lane.b32.xlu1 %v2104_v8, %s2212_s12 }
 0x574   :  { %v2106_v11 = vpop.eup %2105 }
 0x575   :  { %v865_v12 = vadd.f32 1.0, %v2106_v11 }
 0x577   :  { %896 = vperm.xlu1 %2094, %v1744_v9   ;;  %2107 = vrcp.f32 %v865_v12 }
 0x581   :  { %v2108_v13 = vpop.eup %2107 }
 0x582   :  { %v869_v17 = vmul.f32 %v2108_v13, %v783_v16 }
 0x5e5   :  { %v872_v14 = vpop.permute.xlu1 %871 }
 0x5e6   :  { %v874_v15 = vmul.f32 %v2108_v13, %v872_v14 }
 0x5e8   :  { %876 = vrot.lane.b32.xlu0 %v874_v15, %s2211_s9 }
 0x5f6   :  { %v897_v23 = vpop.permute.xlu1 %896 }
 0x65a   :  { %v877_v18 = vpop.permute.xlu0 %876 }
 0x65b   :  { %v879_v19 = vadd.f32 %v877_v18, %v869_v17  ;;  %v1753_v17 = vld [vmem:[%s2709_s2 + $0x28] sm:$0xff] }
 0x65d   :  { %2109 = vtanh.f32 %v879_v19 }
 0x667   :  { %v2110_v20 = vpop.eup %2109 }
 0x668   :  { %882 = vrot.lane.b32.xlu0 %v2110_v20, %s2212_s12 }
 0x6da   :  { %v883_v21 = vpop.permute.xlu0 %882 }
 0x6db   :  { %v2518_v22 = vmul.f32 %v2108_v13, %v883_v21 }
 0x6dd   :  { %v899_v24 = vmul.f32 %v897_v23, %v2518_v22 }
 0x6df   :  { %904 = vrot.lane.b32.xlu1 %v899_v24, %s2211_s9 }
 0x751   :  { %v905_v25 = vpop.permute.xlu1 %904 }
 0x752   :  { %1951 = vmatmul.mubr.msk.f32.vlgmr.msra.gmra.mrb[12].mxu1 %vm232_vm1, %v905_v25 }
 0x753   :  { %2048 = vmatpush3.bf16.msra.mxu1 %v2399_v56  ;;  %1961 = vmatprep.mubr.msk.f32.mxu1 %vm2209_vm3, %v2210_v0 }
 0x754   :  { %2049 = vmatprep.subr.bf16.mxu1 %v2208_v53 }
 0x757   :  { %2051 = vmatpush3.bf16.msra.mxu1 %v2409_v59 }
 0x758   :  { %2058 = vmatprep.subr.bf16.mxu1 %v2208_v53 }
 0x825   :  { %v974_v26 = vpop.f32.mrb[12].mxu1 }
 0x826   :  { %v978_v27 = vadd.f32 %v974_v26, %v2485_v38  ;;  %v1952_v28 = vpop.f32.mrb[13].mxu1  ;;  %v900_v38 = vmul.f32 %v897_v23, %v879_v19 }
 0x828   :  { %2111 = vtanh.f32 %v978_v27  ;;  %v1746_v31 = vmul.f32 -1.442695, %v978_v27 }
 0x82a   :  { %2113 = vpow2.f32 %v1746_v31 }
 0x832   :  { %v2112_v29 = vpop.eup %2111 }
 0x833   :  { %988 = vrot.lane.b32.xlu0 %v2112_v29, %s2212_s12 }
 0x834   :  { %v2114_v32 = vpop.eup %2113 }
 0x835   :  { %v982_v33 = vadd.f32 1.0, %v2114_v32 }
 0x837   :  { %1013 = vperm.xlu0 %2093, %v1747_v30   ;;  %2115 = vrcp.f32 %v982_v33 }
 0x841   :  { %v2116_v34 = vpop.eup %2115 }
 0x842   :  { %v986_v39 = vmul.f32 %v2116_v34, %v900_v38 }
 0x8a5   :  { %v989_v35 = vpop.permute.xlu0 %988 }
 0x8a6   :  { %v991_v37 = vmul.f32 %v2116_v34, %v989_v35 }
 0x8a8   :  { %993 = vrot.lane.b32.xlu1 %v991_v37, %s2211_s9 }
 0x8b6   :  { %v1014_v49 = vpop.permute.xlu0 %1013 }
 0x91a   :  { %v994_v41 = vpop.permute.xlu1 %993 }
 0x91b   :  { %v996_v43 = vadd.f32 %v994_v41, %v986_v39  ;;  %v1756_v39 = vld [vmem:[%s2709_s2 + $0x30] sm:$0xff] }
 0x91d   :  { %2117 = vtanh.f32 %v996_v43 }
 0x927   :  { %v2118_v45 = vpop.eup %2117 }
 0x928   :  { %999 = vrot.lane.b32.xlu1 %v2118_v45, %s2212_s12 }
 0x99a   :  { %v1000_v47 = vpop.permute.xlu1 %999 }
 0x99b   :  { %v2536_v48 = vmul.f32 %v2116_v34, %v1000_v47 }
 0x99d   :  { %v1016_v50 = vmul.f32 %v1014_v49, %v2536_v48 }
 0x99f   :  { %1021 = vrot.lane.b32.xlu0 %v1016_v50, %s2211_s9 }
 0xa11   :  { %v1022_v51 = vpop.permute.xlu0 %1021 }
 0xa12   :  { %1962 = vmatmul.mubr.msk.f32.vlgmr.msra.gmra.mrb[14].mxu1 %vm232_vm1, %v1022_v51 }
 0xa13   :  { %2060 = vmatpush3.bf16.msra.mxu1 %v2399_v56  ;;  %1983 = vmatprep.mubr.msk.f32.mxu1 %vm2209_vm3, %v2210_v0 }
 0xa14   :  { %2061 = vmatprep.subr.bf16.mxu1 %v2208_v53 }
 0xa17   :  { %2063 = vmatpush3.bf16.msra.mxu1 %v2409_v59 }
 0xa18   :  { %2070 = vmatprep.subr.bf16.mxu1 %v2208_v53 }
 0xae5   :  { %v1091_v52 = vpop.f32.mrb[14].mxu1 }
 0xae6   :  { %v1095_v54 = vadd.f32 %v1091_v52, %v2483_v36  ;;  %v1963_v55 = vpop.f32.mrb[15].mxu1  ;;  %v1017_v36 = vmul.f32 %v1014_v49, %v996_v43 }
 0xae8   :  { %2119 = vtanh.f32 %v1095_v54  ;;  %v1749_v60 = vmul.f32 -1.442695, %v1095_v54 }
 0xaea   :  { %2121 = vpow2.f32 %v1749_v60 }
 0xaf2   :  { %v2120_v57 = vpop.eup %2119 }
 0xaf3   :  { %1105 = vrot.lane.b32.xlu1 %v2120_v57, %s2212_s12 }
 0xaf4   :  { %v2122_v61 = vpop.eup %2121 }
 0xaf5   :  { %v1099_v62 = vadd.f32 1.0, %v2122_v61 }
 0xaf7   :  { %1130 = vperm.xlu1 %2094, %v1750_v58   ;;  %2123 = vrcp.f32 %v1099_v62 }
 0xb01   :  { %v2124_v63 = vpop.eup %2123 }
 0xb02   :  { %v1103_v4 = vmul.f32 %v2124_v63, %v1017_v36 }
 0xb65   :  { %v1106_v2 = vpop.permute.xlu1 %1105 }
 0xb66   :  { %v1108_v3 = vmul.f32 %v2124_v63, %v1106_v2 }
 0xb68   :  { %1110 = vrot.lane.b32.xlu0 %v1108_v3, %s2211_s9 }
 0xb76   :  { %v1131_v10 = vpop.permute.xlu1 %1130 }
 0xbda   :  { %v1111_v5 = vpop.permute.xlu0 %1110 }
 0xbdb   :  { %v1113_v6 = vadd.f32 %v1111_v5, %v1103_v4 }
 0xbdd   :  { %2125 = vtanh.f32 %v1113_v6 }
 0xbe7   :  { %v2126_v7 = vpop.eup %2125 }
 0xbe8   :  { %1116 = vrot.lane.b32.xlu0 %v2126_v7, %s2212_s12 }
 0xc5a   :  { %v1117_v8 = vpop.permute.xlu0 %1116 }
 0xc5b   :  { %v2554_v9 = vmul.f32 %v2124_v63, %v1117_v8  ;;  %v1759_v63 = vld [vmem:[%s2709_s2 + $0x38] sm:$0xff] }
 0xc5d   :  { %v1133_v11 = vmul.f32 %v1131_v10, %v2554_v9 }
 0xc5f   :  { %1138 = vrot.lane.b32.xlu1 %v1133_v11, %s2211_s9 }
 0xcd1   :  { %v1139_v12 = vpop.permute.xlu1 %1138 }
 0xcd2   :  { %1973 = vmatmul.mubr.msk.f32.vlgmr.msra.gmra.mrb[16].mxu0 %vm232_vm1, %v1139_v12 }
 0xcd3   :  { %2066 = vmatpush3.bf16.msra.mxu0 %v2399_v56  ;;  %1994 = vmatprep.mubr.msk.f32.mxu0 %vm2209_vm3, %v2210_v0 }
 0xcd4   :  { %2067 = vmatprep.subr.bf16.mxu0 %v2208_v53 }
 0xcd7   :  { %2069 = vmatpush3.bf16.msra.mxu0 %v2409_v59 }
 0xda5   :  { %v1208_v13 = vpop.f32.mrb[16].mxu0 }
 0xda6   :  { %v1212_v14 = vadd.f32 %v1208_v13, %v2489_v42  ;;  %v1974_v15 = vpop.f32.mrb[17].mxu0  ;;  %v1134_v42 = vmul.f32 %v1131_v10, %v1113_v6 }
 0xda8   :  { %2127 = vtanh.f32 %v1212_v14  ;;  %v1752_v18 = vmul.f32 -1.442695, %v1212_v14 }
 0xdaa   :  { %2129 = vpow2.f32 %v1752_v18 }
 0xdb2   :  { %v2128_v16 = vpop.eup %2127 }
 0xdb3   :  { %1222 = vrot.lane.b32.xlu0 %v2128_v16, %s2212_s12 }
 0xdb4   :  { %v2130_v19 = vpop.eup %2129 }
 0xdb5   :  { %v1216_v20 = vadd.f32 1.0, %v2130_v19 }
 0xdb7   :  { %1247 = vperm.xlu0 %2093, %v1753_v17   ;;  %2131 = vrcp.f32 %v1216_v20 }
 0xdc1   :  { %v2132_v21 = vpop.eup %2131 }
 0xdc2   :  { %v1220_v25 = vmul.f32 %v2132_v21, %v1134_v42 }
 0xe25   :  { %v1223_v23 = vpop.permute.xlu0 %1222 }
 0xe26   :  { %v1225_v24 = vmul.f32 %v2132_v21, %v1223_v23 }
 0xe28   :  { %1227 = vrot.lane.b32.xlu1 %v1225_v24, %s2211_s9 }
 0xe36   :  { %v1248_v31 = vpop.permute.xlu0 %1247 }
 0xe9a   :  { %v1228_v26 = vpop.permute.xlu1 %1227 }
 0xe9b   :  { %v1230_v27 = vadd.f32 %v1228_v26, %v1220_v25 }
 0xe9d   :  { %2133 = vtanh.f32 %v1230_v27 }
 0xea7   :  { %v2134_v28 = vpop.eup %2133 }
 0xea8   :  { %1233 = vrot.lane.b32.xlu1 %v2134_v28, %s2212_s12 }
 0xf1a   :  { %v1234_v29 = vpop.permute.xlu1 %1233 }
 0xf1b   :  { %v2571_v30 = vmul.f32 %v2132_v21, %v1234_v29 }
 0xf1d   :  { %v1250_v32 = vmul.f32 %v1248_v31, %v2571_v30 }
 0xf1f   :  { %1255 = vrot.lane.b32.xlu0 %v1250_v32, %s2211_s9 }
 0xf91   :  { %v1256_v33 = vpop.permute.xlu0 %1255 }
 0xf92   :  { %1984 = vmatmul.mubr.msk.f32.vlgmr.msra.gmra.mrb[16].mxu1 %vm232_vm1, %v1256_v33 }
 0xf93   :  { %2072 = vmatpush3.bf16.msra.mxu1 %v2399_v56  ;;  %2005 = vmatprep.mubr.msk.f32.mxu1 %vm2209_vm3, %v2210_v0 }
 0xf94   :  { %2073 = vmatprep.subr.bf16.mxu1 %v2208_v53 }
 0xf97   :  { %2075 = vmatpush3.bf16.msra.mxu1 %v2409_v59 }
0x1065   :  { %v1325_v34 = vpop.f32.mrb[16].mxu1 }
0x1066   :  { %v1329_v35 = vadd.f32 %v1325_v34, %v2487_v40  ;;  %v1985_v37 = vpop.f32.mrb[17].mxu1  ;;  %v1251_v40 = vmul.f32 %v1248_v31, %v1230_v27 }
0x1068   :  { %2135 = vtanh.f32 %v1329_v35  ;;  %v1755_v56 = vmul.f32 -1.442695, %v1329_v35 }
0x106a   :  { %2137 = vpow2.f32 %v1755_v56 }
0x1072   :  { %v2136_v38 = vpop.eup %2135 }
0x1073   :  { %1339 = vrot.lane.b32.xlu1 %v2136_v38, %s2212_s12 }
0x1074   :  { %v2138_v0 = vpop.eup %2137 }
0x1075   :  { %v1333_v41 = vadd.f32 1.0, %v2138_v0 }
0x1077   :  { %1364 = vperm.xlu1 %2094, %v1756_v39   ;;  %2139 = vrcp.f32 %v1333_v41 }
0x1081   :  { %v2140_v53 = vpop.eup %2139 }
0x1082   :  { %v1337_v45 = vmul.f32 %v2140_v53, %v1251_v40 }
0x10e5   :  { %v1340_v59 = vpop.permute.xlu1 %1339 }
0x10e6   :  { %v1342_v43 = vmul.f32 %v2140_v53, %v1340_v59 }
0x10e8   :  { %1344 = vrot.lane.b32.xlu0 %v1342_v43, %s2211_s9 }
0x10f6   :  { %v1365_v54 = vpop.permute.xlu1 %1364 }
0x115a   :  { %v1345_v47 = vpop.permute.xlu0 %1344 }
0x115b   :  { %v1347_v49 = vadd.f32 %v1345_v47, %v1337_v45 }
0x115d   :  { %2141 = vtanh.f32 %v1347_v49 }
0x1167   :  { %v2142_v50 = vpop.eup %2141 }
0x1168   :  { %1350 = vrot.lane.b32.xlu0 %v2142_v50, %s2212_s12  ;;  %v2634_v50 = vld [vmem:[#allocation4] ss:$0 sm:$0xff] }
0x11da   :  { %v1351_v51 = vpop.permute.xlu0 %1350 }
0x11db   :  { %v2588_v52 = vmul.f32 %v2140_v53, %v1351_v51 }
0x11dd   :  { %v1367_v55 = vmul.f32 %v1365_v54, %v2588_v52 }
0x11df   :  { %1372 = vrot.lane.b32.xlu1 %v1367_v55, %s2211_s9 }
0x1251   :  { %v1373_v57 = vpop.permute.xlu1 %1372 }
0x1252   :  { %1995 = vmatmul.mubr.msk.f32.vlgmr.msra.gmra.mrb[18].mxu0 %vm232_vm1, %v1373_v57 }
0x1325   :  { %v1442_v58 = vpop.f32.mrb[18].mxu0 }
0x1326   :  { %v1446_v60 = vadd.f32 %v1442_v58, %v2493_v46  ;;  %v1996_v61 = vpop.f32.mrb[19].mxu0  ;;  %v1368_v46 = vmul.f32 %v1365_v54, %v1347_v49 }
0x1328   :  { %2143 = vtanh.f32 %v1446_v60  ;;  %v1758_v2 = vmul.f32 -1.442695, %v1446_v60 }
0x132a   :  { %2145 = vpow2.f32 %v1758_v2 }
0x1332   :  { %v2144_v62 = vpop.eup %2143 }
0x1333   :  { %1456 = vrot.lane.b32.xlu0 %v2144_v62, %s2212_s12 }
0x1334   :  { %v2146_v3 = vpop.eup %2145 }
0x1335   :  { %v1450_v36 = vadd.f32 1.0, %v2146_v3 }
0x1337   :  { %1481 = vperm.xlu0 %2093, %v1759_v63   ;;  %2147 = vrcp.f32 %v1450_v36 }
0x1341   :  { %v2148_v4 = vpop.eup %2147 }
0x1342   :  { %v1454_v7 = vmul.f32 %v2148_v4, %v1368_v46 }
0x13a5   :  { %v1457_v5 = vpop.permute.xlu0 %1456 }
0x13a6   :  { %v1459_v6 = vmul.f32 %v2148_v4, %v1457_v5 }
0x13a8   :  { %1461 = vrot.lane.b32.xlu1 %v1459_v6, %s2211_s9 }
0x13b6   :  { %v1482_v14 = vpop.permute.xlu0 %1481 }
0x141a   :  { %v1462_v8 = vpop.permute.xlu1 %1461 }
0x141b   :  { %v1464_v10 = vadd.f32 %v1462_v8, %v1454_v7 }
0x141d   :  { %2149 = vtanh.f32 %v1464_v10 }
0x1427   :  { %v2150_v11 = vpop.eup %2149 }
0x1428   :  { %1467 = vrot.lane.b32.xlu1 %v2150_v11, %s2212_s12 }
0x149a   :  { %v1468_v12 = vpop.permute.xlu1 %1467 }
0x149b   :  { %v1470_v13 = vmul.f32 %v2148_v4, %v1468_v12 }
0x149d   :  { %v1484_v15 = vmul.f32 %v1482_v14, %v1470_v13 }
0x149f   :  { %1489 = vrot.lane.b32.xlu0 %v1484_v15, %s2211_s9 }
0x1511   :  { %v1490_v16 = vpop.permute.xlu0 %1489 }
0x1512   :  { %2006 = vmatmul.mubr.msk.f32.vlgmr.msra.gmra.mrb[18].mxu1 %vm232_vm1, %v1490_v16 }
0x15e5   :  { %v1559_v17 = vpop.f32.mrb[18].mxu1 }
0x15e6   :  { %v1563_v18 = vadd.f32 %v1559_v17, %v2491_v44  ;;  %v2007_v19 = vpop.f32.mrb[19].mxu1  ;;  %v1485_v44 = vmul.f32 %v1482_v14, %v1464_v10 }
0x15e8   :  { %2151 = vtanh.f32 %v1563_v18  ;;  %v1761_v21 = vmul.f32 -1.442695, %v1563_v18 }
0x15ea   :  { %2153 = vpow2.f32 %v1761_v21 }
0x15f2   :  { %v2152_v20 = vpop.eup %2151 }
0x15f3   :  { %1573 = vrot.lane.b32.xlu1 %v2152_v20, %s2212_s12 }
0x15f4   :  { %v2154_v23 = vpop.eup %2153 }
0x15f5   :  { %v1567_v24 = vadd.f32 1.0, %v2154_v23 }
0x15f7   :  { %2155 = vrcp.f32 %v1567_v24 }
0x1601   :  { %v2156_v42 = vpop.eup %2155 }
0x1602   :  { %v1571_v27 = vmul.f32 %v2156_v42, %v1485_v44 }
0x1665   :  { %v1574_v25 = vpop.permute.xlu1 %1573 }
0x1666   :  { %v1576_v26 = vmul.f32 %v2156_v42, %v1574_v25 }
0x1668   :  { %1578 = vrot.lane.b32.xlu0 %v1576_v26, %s2211_s9 }
0x166c   :  { %771 = vrot.lane.b32.xlu0 %v2501_v1, %s2211_s9  ;;  %v1762_v1 = vld [vmem:[%s2720_s13] ss:$0 sm:$0xff] }
0x1670   :  { %1004 = vrot.lane.b32.xlu0 %v2536_v48, %s2211_s9 }
0x1674   :  { %1238 = vrot.lane.b32.xlu0 %v2571_v30, %s2211_s9 }
0x1678   :  { %1472 = vrot.lane.b32.xlu0 %v1470_v13, %s2211_s9 }
0x16da   :  { %v1579_v28 = vpop.permute.xlu0 %1578 }
0x16db   :  { %v1581_v29 = vadd.f32 %v1579_v28, %v1571_v27 }
0x16dd   :  { %2157 = vtanh.f32 %v1581_v29 }
0x16de   :  { %v772_v31 = vpop.permute.xlu0 %771 }
0x16df   :  { %774 = vst.msk [vmem:[#allocation3] sm:$0xff] %vm232_vm1, %v772_v31 }
0x16e2   :  { %v1005_v32 = vpop.permute.xlu0 %1004 }
0x16e3   :  { %1008 = vst.msk [vmem:[#allocation3 + $0x10] sm:$0xff] %vm232_vm1, %v1005_v32 }
0x16e6   :  { %v1239_v48 = vpop.permute.xlu0 %1238  ;;  %v1600_v33 = vld [vmem:[#allocation3] sm:$0xff] }
0x16e7   :  { %v2158_v30 = vpop.eup %2157  ;;  %1242 = vst.msk [vmem:[#allocation3 + $0x20] sm:$0xff] %vm232_vm1, %v1239_v48  ;;  %v1615_v34 = vmul.f32 %v1762_v1, %v1600_v33 }
0x16e8   :  { %1584 = vrot.lane.b32.xlu1 %v2158_v30, %s2212_s12 }
0x16e9   :  { %v1623_v35 = vsel %vm232_vm1, %v1615_v34, 0.0 }
0x16ea   :  { %1624 = vadd.xlane.f32.xlu0 %v1623_v35  ;;  %v1473_v37 = vpop.permute.xlu0 %1472  ;;  %v1602_v38 = vld [vmem:[#allocation3 + $0x10] sm:$0xff] }
0x16eb   :  { %1476 = vst.msk [vmem:[#allocation3 + $0x30] sm:$0xff] %vm232_vm1, %v1473_v37  ;;  %v1617_v39 = vmul.f32 %v1762_v1, %v1602_v38 }
0x16ec   :  { %887 = vrot.lane.b32.xlu1 %v2518_v22, %s2211_s9 }
0x16ed   :  { %v1629_v56 = vsel %vm232_vm1, %v1617_v39, 0.0 }
0x16ee   :  { %1630 = vadd.xlane.f32.xlu0 %v1629_v56  ;;  %v1604_v60 = vld [vmem:[#allocation3 + $0x20] sm:$0xff] }
0x16ef   :  { %v1619_v62 = vmul.f32 %v1762_v1, %v1604_v60 }
0x16f0   :  { %1121 = vrot.lane.b32.xlu1 %v2554_v9, %s2211_s9 }
0x16f1   :  { %v1635_v2 = vsel %vm232_vm1, %v1619_v62, 0.0 }
0x16f2   :  { %v1606_v63 = vld [vmem:[#allocation3 + $0x30] sm:$0xff] }
0x16f3   :  { %v1621_v3 = vmul.f32 %v1762_v1, %v1606_v63 }
0x16f4   :  { %1355 = vrot.lane.b32.xlu1 %v2588_v52, %s2211_s9 }
0x16f5   :  { %v1641_v36 = vsel %vm232_vm1, %v1621_v3, 0.0 }
0x175a   :  { %v1585_v0 = vpop.permute.xlu1 %1584 }
0x175b   :  { %v1587_v41 = vmul.f32 %v2156_v42, %v1585_v0 }
0x175d   :  { %1589 = vrot.lane.b32.xlu1 %v1587_v41, %s2211_s9 }
0x175e   :  { %v888_v53 = vpop.permute.xlu1 %887 }
0x175f   :  { %891 = vst.msk [vmem:[#allocation3 + $0x8] sm:$0xff] %vm232_vm1, %v888_v53 }
0x1762   :  { %v1122_v59 = vpop.permute.xlu1 %1121 }
0x1763   :  { %1125 = vst.msk [vmem:[#allocation3 + $0x18] sm:$0xff] %vm232_vm1, %v1122_v59 }
0x1766   :  { %v1356_v22 = vpop.permute.xlu1 %1355  ;;  %v1601_v54 = vld [vmem:[#allocation3 + $0x8] sm:$0xff] }
0x1767   :  { %1359 = vst.msk [vmem:[#allocation3 + $0x28] sm:$0xff] %vm232_vm1, %v1356_v22  ;;  %v1616_v58 = vmul.f32 %v1762_v1, %v1601_v54 }
0x1769   :  { %v1626_v61 = vsel %vm232_vm1, %v1616_v58, 0.0 }
0x176a   :  { %v1603_v43 = vld [vmem:[#allocation3 + $0x18] sm:$0xff] }
0x176b   :  { %v1618_v40 = vmul.f32 %v1762_v1, %v1603_v43 }
0x176d   :  { %v1632_v9 = vsel %vm232_vm1, %v1618_v40, 0.0 }
0x176e   :  { %1633 = vadd.xlane.f32.xlu0 %v1632_v9  ;;  %v1605_v45 = vld [vmem:[#allocation3 + $0x28] sm:$0xff] }
0x176f   :  { %v1620_v47 = vmul.f32 %v1762_v1, %v1605_v45 }
0x1771   :  { %v1638_v49 = vsel %vm232_vm1, %v1620_v47, 0.0 }
0x1772   :  { %1639 = vadd.xlane.f32.xlu0 %v1638_v49 }
0x1777   :  { %v1625_v51 = vpop.xlane.xlu0 %1624 }
0x1778   :  { %v1654_v52 = vadd.f32 %v2634_v50, %v1625_v51 }
0x177a   :  { %1663 = vst.msk [vmem:[%s2722_s15] sm:$0xff] %vm1662_vm5, %v1654_v52 }
0x177b   :  { %v1631_v55 = vpop.xlane.xlu0 %1630 }
0x177c   :  { %v1656_v57 = vadd.f32 %v2634_v50, %v1631_v55 }
0x177e   :  { %1665 = vst.msk [vmem:[%s2722_s15 + $0x10] sm:$0xff] %vm1662_vm5, %v1656_v57 }
0x1781   :  { %1627 = vadd.xlane.f32.xlu1 %v1626_v61 }
0x1785   :  { %1636 = vadd.xlane.f32.xlu1 %v1635_v2 }
0x1789   :  { %1642 = vadd.xlane.f32.xlu1 %v1641_v36 }
0x179a   :  { %1596 = vrot.lane.b32.xlu1 %v1581_v29, %s2213_s21 }
0x17cf   :  { %v1590_v4 = vpop.permute.xlu1 %1589 }
0x17d0   :  { %1593 = vst.msk [vmem:[#allocation3 + $0x38] sm:$0xff] %vm232_vm1, %v1590_v4  ;;  %1594 = vst.msk [vmem:[#allocation5] sm:$0xff] %vm232_vm1, %v1590_v4 }
0x17d7   :  { %v1607_v5 = vld [vmem:[#allocation3 + $0x38] sm:$0xff] }
0x17d8   :  { %v1622_v6 = vmul.f32 %v1762_v1, %v1607_v5 }
0x17da   :  { %v1644_v46 = vsel %vm232_vm1, %v1622_v6, 0.0 }
0x17db   :  { %1645 = vadd.xlane.f32.xlu0 %v1644_v46 }
0x17dc   :  { %2170 = shalt.err (!%p2167_p4)
}
0x17dd   :  { %s2171_s25 = scalar_lea.hbm %s2723_s16, 128 }
0x17de   :  { %p2172_p5 = scmp.ne.s32.totalorder %s2723_s16, %s2171_s25  ;;  %p2175_p6 = scmp.lt.u32.totalorder %s2171_s25, %s2723_s16 }
0x17e0   :  { %p2177_p7 = pnand %p2175_p6, %p2172_p5 }
0x17e2   :  { %2180 = shalt.err (!%p2177_p7)
}
0x17e3   :  { %1682 = dma.vmem_to_hbm [thread:$0]  %s1680_s7, 128, %s2723_s16, [#allocation6]  }
0x17e4   :  { %s2215_s1 = smov [#allocation7]  }
0x17e5   :  { %s1689_s8 = sshll.u32 %s2215_s1, 4  ;;  %s1690_s8 = int_to_ptr.vmem [resolvable:$true] %s1689_s8 }
0x17e6   :  { %s2181_s13 = scalar_lea.vmem %s1690_s8, 128  ;;  %p2186_p9 = scmp.lt.s32.totalorder %s1690_s8, %s1690_s8 }
0x17e7   :  { %p2182_p8 = scmp.ne.s32.totalorder %s1690_s8, %s2181_s13  ;;  %p2187_p10 = scmp.lt.s32.totalorder %s2181_s13, %s2181_s13 }
0x17e9   :  { %p2188_p11 = por %p2187_p10, %p2186_p9 }
0x17eb   :  { %p2189_p12 = pnand %p2188_p11, %p2182_p8 }
0x17fb   :  { %v1634_v7 = vpop.xlane.xlu0 %1633 }
0x17fc   :  { %v1657_v8 = vadd.f32 %v2634_v50, %v1634_v7 }
0x17fe   :  { %1666 = vst.msk [vmem:[%s2722_s15 + $0x18] sm:$0xff] %vm1662_vm5, %v1657_v8 }
0x17ff   :  { %v1640_v10 = vpop.xlane.xlu0 %1639 }
0x1800   :  { %v1659_v11 = vadd.f32 %v2634_v50, %v1640_v10 }
0x1802   :  { %1668 = vst.msk [vmem:[%s2722_s15 + $0x28] sm:$0xff] %vm1662_vm5, %v1659_v11 }
0x180e   :  { %v1628_v12 = vpop.xlane.xlu1 %1627 }
0x180f   :  { %v1655_v13 = vadd.f32 %v2634_v50, %v1628_v12 }
0x1811   :  { %1664 = vst.msk [vmem:[%s2722_s15 + $0x8] sm:$0xff] %vm1662_vm5, %v1655_v13 }
0x1812   :  { %v1637_v14 = vpop.xlane.xlu1 %1636 }
0x1813   :  { %v1658_v15 = vadd.f32 %v2634_v50, %v1637_v14 }
0x1815   :  { %1667 = vst.msk [vmem:[%s2722_s15 + $0x20] sm:$0xff] %vm1662_vm5, %v1658_v15 }
0x1816   :  { %v1643_v16 = vpop.xlane.xlu1 %1642 }
0x1817   :  { %v1660_v17 = vadd.f32 %v2634_v50, %v1643_v16 }
0x1819   :  { %1669 = vst.msk [vmem:[%s2722_s15 + $0x30] sm:$0xff] %vm1662_vm5, %v1660_v17 }
0x181a   :  { %v1597_v18 = vpop.permute.xlu1 %1596 }
0x181b   :  { %1599 = vst.msk [vmem:[#allocation7] sm:$0xff] %vm232_vm1, %v1597_v18 }
0x181c   :  { %2192 = shalt.err (!%p2189_p12)
}
0x181d   :  { %s2193_s20 = scalar_lea.hbm %s2724_s17, 128 }
0x181e   :  { %p2194_p13 = scmp.ne.s32.totalorder %s2724_s17, %s2193_s20  ;;  %p2197_p0 = scmp.lt.u32.totalorder %s2193_s20, %s2724_s17 }
0x1820   :  { %p2199_p1 = pnand %p2197_p0, %p2194_p13 }
0x1822   :  { %2202 = shalt.err (!%p2199_p1)
}
0x1823   :  { %1692 = dma.vmem_to_hbm [thread:$0]  %s1690_s8, 128, %s2724_s17, [#allocation8]  }
0x1868   :  { %v1646_v19 = vpop.xlane.xlu0 %1645 }
0x1869   :  { %v1661_v20 = vadd.f32 %v2634_v50, %v1646_v19 }
0x186b   :  { %1670 = vst.msk [vmem:[%s2722_s15 + $0x38] sm:$0xff] %vm1662_vm5, %v1661_v20 }
0x186c   :  { %2203 = dma.done.wait [#allocation6], 128  }
0x186d   :  { %2204 = vsyncadd [#allocation6], 4294967168 }
0x186e   :  { %2205 = dma.done.wait [#allocation8], 128  }
0x186f   :  { %2206 = vsyncadd [#allocation8], 4294967168 }
0x1870   :  { %1701 = vsyncpa [#allocation6], 1 }
0x1871   :  { %1702 = vsyncpa [#allocation8], 1 }

</bundles_post_ra>
